<compile_context>
chip_gen: v7x
topology: tpu7x:2x2x1
jax: 0.10.0
libtpu: 0.0.40
codegen_flags: <defaults>
</compile_context>

<pallas_src>
import math
from functools import partial

import jax
import jax.numpy as jnp
from jax import lax
from jax.experimental import pallas as pl
from jax.experimental.pallas import tpu as pltpu

EMBED_SIZE = 64
HIDDEN_SIZE = 128


def _round_up(x, m):
    return ((x + m - 1) // m) * m


def _make_kernel(T, B_pad):
    """LSTM recurrence + final FC, fully resident in VMEM.

    Inputs (all VMEM):
      seq_ref : (T*B_pad, 1) int32 token ids, row index = t*B_pad + b
      tbl_ref : (V_pad, 4H)  f32  precomputed  embed @ W_ih^T + (b_ih+b_hh),
                              gate columns ordered [i | f | o | g]
      whh_ref : (H, 4H)      f32  W_hh^T, columns [i | f | o | g]
      wfc_ref : (H, V_out)   f32  FC weight^T, lane-padded to 128
      bfc_ref : (1, V_out)   f32  FC bias, lane-padded
    Output:
      out_ref : (B_pad, V_out) f32 logits (padding garbage sliced off outside)
    Scratch:
      gx_ref  : (T*B_pad, 4H) f32 hoisted input projection
    """

    def kernel(seq_ref, tbl_ref, whh_ref, wfc_ref, bfc_ref, out_ref, gx_ref):
        TB = gx_ref.shape[0]
        Vt = tbl_ref.shape[0]
        H = whh_ref.shape[0]
        H3 = 3 * H

        # --- Fused embedding gather + input projection + bias -------------
        # One-hot @ table on the MXU (exact: each one-hot row has a single 1).
        tok = seq_ref[...]                                          # (TB, 1)
        cols = lax.broadcasted_iota(jnp.int32, (TB, Vt), 1)
        onehot = (tok == cols).astype(jnp.float32)                  # (TB, Vt)
        gx_ref[...] = jnp.dot(onehot, tbl_ref[...],
                              preferred_element_type=jnp.float32)   # (TB, 4H)

        def gate_math(gates, c_prev, first):
            # One wide sigmoid over [i|f|o] + one tanh over [g].
            sig = jax.nn.sigmoid(gates[:, :H3])
            i_g = sig[:, 0 * H:1 * H]
            f_g = sig[:, 1 * H:2 * H]
            o_g = sig[:, 2 * H:3 * H]
            g_g = jnp.tanh(gates[:, H3:])
            c_new = i_g * g_g if first else f_g * c_prev + i_g * g_g
            h_new = o_g * jnp.tanh(c_new)
            return h_new, c_new

        # --- Peeled step 0: h0 == c0 == 0 -> no recurrent matmul ----------
        h, c = gate_math(gx_ref[pl.ds(0, B_pad), :], None, True)

        # --- Remaining steps (unrolled, static offsets) --------------------
        # whh_ref is read at the dot so the (H,4H) weight streams from VMEM
        # instead of pinning 64 vregs across the unrolled recurrence.
        for t in range(1, T):
            gates = gx_ref[pl.ds(t * B_pad, B_pad), :] + jnp.dot(
                h, whh_ref[...], preferred_element_type=jnp.float32)
            h, c = gate_math(gates, c, False)

        # --- Final linear layer on last hidden (lane-dense output) ---------
        out_ref[...] = (jnp.dot(h, wfc_ref[...],
                                preferred_element_type=jnp.float32)
                        + bfc_ref[...])

    return kernel


def _permute_gate_cols(m):
    """PyTorch gate order [i|f|g|o] -> kernel order [i|f|o|g] along last axis."""
    i, f, g, o = jnp.split(m, 4, axis=-1)
    return jnp.concatenate([i, f, o, g], axis=-1)


def prepare_params(params):
    """One-time conversion of PyTorch-layout params into kernel layout.

    Hoisted out of the per-call forward path so the transposes / permutes /
    padding and the embed @ W_ih^T table build are paid exactly once.
    """
    H = params["w_hh"].shape[1]
    V = params["embed"].shape[0]
    V1 = params["fc_w"].shape[0]
    V_tbl = _round_up(V, 128)      # lane-dense one-hot K dim
    V_out = _round_up(V1, 128)     # lane-dense FC output width

    wih_t = _permute_gate_cols(params["w_ih"].T.astype(jnp.float32))   # (E,4H)
    whh_t = _permute_gate_cols(params["w_hh"].T.astype(jnp.float32))   # (H,4H)
    bias = _permute_gate_cols(
        (params["b_ih"] + params["b_hh"]).astype(jnp.float32))         # (4H,)

    # Token-indexed fused table: tbl[v] = embed[v] @ W_ih^T + (b_ih + b_hh).
    # Gathering this row later is mathematically identical to gather-then-dot.
    tbl = jnp.dot(params["embed"].astype(jnp.float32), wih_t,
                  precision=lax.Precision.HIGHEST) + bias[None, :]      # (V,4H)
    tbl = jnp.pad(tbl, ((0, V_tbl - V), (0, 0)))

    wfc_t = jnp.zeros((H, V_out), jnp.float32).at[:, :V1].set(
        params["fc_w"].T.astype(jnp.float32))
    bfc = jnp.zeros((1, V_out), jnp.float32).at[:, :V1].set(
        params["fc_b"].astype(jnp.float32))

    return dict(tbl=tbl, whh_t=whh_t, wfc_t=wfc_t, bfc=bfc, n_out=int(V1))


@partial(jax.jit, static_argnames=("n_out",))
def _forward_jit(seq, tbl, whh_t, wfc_t, bfc, *, n_out):
    B, T = seq.shape
    H = whh_t.shape[0]
    V_out = wfc_t.shape[1]
    B_pad = _round_up(B, 8)        # f32 sublane multiple
    TB = T * B_pad

    # Per-call glue is only this tiny int pad/transpose (fused under jit);
    # padded batch rows get token 0 (padding_idx) and are sliced off below.
    seq_p = jnp.pad(seq.astype(jnp.int32), ((0, B_pad - B), (0, 0)))
    seq_tm = jnp.transpose(seq_p, (1, 0)).reshape(TB, 1)   # row = t*B_pad + b

    vmem = pl.BlockSpec(memory_space=pltpu.MemorySpace.VMEM)
    out = pl.pallas_call(
        _make_kernel(T, B_pad),
        out_shape=jax.ShapeDtypeStruct((B_pad, V_out), jnp.float32),
        in_specs=[vmem] * 5,
        out_specs=vmem,
        scratch_shapes=[pltpu.VMEM((TB, 4 * H), jnp.float32)],
    )(seq_tm, tbl, whh_t, wfc_t, bfc)

    return out[:B, :n_out]


def policy_forward(seq, kparams):
    """seq: (B, T) or (T,) int token ids -> logits (B, vocab_size-1) f32."""
    seq = jnp.asarray(seq, jnp.int32)
    if seq.ndim == 1:
        seq = seq[None, :]
    return _forward_jit(seq, kparams["tbl"], kparams["whh_t"],
                        kparams["wfc_t"], kparams["bfc"],
                        n_out=kparams["n_out"])


def init_params(key, vocab_size, embed_size=EMBED_SIZE, hidden_size=HIDDEN_SIZE):
    k_emb, k_wih, k_whh, k_bih, k_bhh, k_fc = jax.random.split(key, 6)

    # nn.Embedding: N(0, 1), padding_idx=0 row zeroed.
    embed = jax.random.normal(k_emb, (vocab_size, embed_size), jnp.float32)
    embed = embed.at[0].set(0.0)

    # nn.LSTM default init: U(-1/sqrt(H), 1/sqrt(H)).
    stdv = 1.0 / math.sqrt(hidden_size)
    w_ih = jax.random.uniform(k_wih, (4 * hidden_size, embed_size),
                              jnp.float32, -stdv, stdv)
    w_hh = jax.random.uniform(k_whh, (4 * hidden_size, hidden_size),
                              jnp.float32, -stdv, stdv)
    b_ih = jax.random.uniform(k_bih, (4 * hidden_size,), jnp.float32, -stdv, stdv)
    b_hh = jax.random.uniform(k_bhh, (4 * hidden_size,), jnp.float32, -stdv, stdv)

    # nn.Linear(hidden_size, vocab_size - 1): xavier_uniform weight, zero bias.
    fan_in, fan_out = hidden_size, vocab_size - 1
    bound = math.sqrt(6.0 / (fan_in + fan_out))
    fc_w = jax.random.uniform(k_fc, (vocab_size - 1, hidden_size),
                              jnp.float32, -bound, bound)
    fc_b = jnp.zeros((vocab_size - 1,), jnp.float32)

    return dict(embed=embed, w_ih=w_ih, w_hh=w_hh, b_ih=b_ih, b_hh=b_hh,
                fc_w=fc_w, fc_b=fc_b)


def _reference_forward(seq, params):
    """Pure-JAX reference mirroring torch semantics (PyTorch gate order).

    Matmuls use HIGHEST precision so the f32-accumulating kernel is compared
    against a genuinely f32-accurate reference.
    """
    H = HIDDEN_SIZE
    hp = lax.Precision.HIGHEST
    emb = jnp.take(params["embed"], seq, axis=0)              # (B, T, E)
    B, T, _ = emb.shape
    h = jnp.zeros((B, H), jnp.float32)
    c = jnp.zeros((B, H), jnp.float32)
    for t in range(T):
        gates = (jnp.dot(emb[:, t, :], params["w_ih"].T, precision=hp)
                 + params["b_ih"]
                 + jnp.dot(h, params["w_hh"].T, precision=hp)
                 + params["b_hh"])
        i_g = jax.nn.sigmoid(gates[:, 0 * H:1 * H])
        f_g = jax.nn.sigmoid(gates[:, 1 * H:2 * H])
        g_g = jnp.tanh(gates[:, 2 * H:3 * H])
        o_g = jax.nn.sigmoid(gates[:, 3 * H:4 * H])
        c = f_g * c + i_g * g_g
        h = o_g * jnp.tanh(c)
    return jnp.dot(h, params["fc_w"].T, precision=hp) + params["fc_b"]


if __name__ == "__main__":
    vocab_size = 16
    batch, seq_len = 2, 8

    key = jax.random.PRNGKey(0)
    k_params, k_seq = jax.random.split(key)
    params = init_params(k_params, vocab_size)
    kparams = prepare_params(params)      # one-time kernel-layout weight prep

    seq = jax.random.randint(k_seq, (batch, seq_len), 0, vocab_size, jnp.int32)

    logits = policy_forward(seq, kparams)
    logits = jax.block_until_ready(logits)

    ref = _reference_forward(seq, params)
    assert logits.shape == (batch, vocab_size - 1)
    assert jnp.allclose(logits, ref, atol=1e-4, rtol=1e-4), (
        float(jnp.max(jnp.abs(logits - ref))))

    print("KERNEL_OK")
</pallas_src>

<mosaic_0001>
module attributes {stable_mosaic.version = 11 : i64} {
  func.func @kernel(%arg0: memref<64x1xi32, #tpu.memory_space<vmem>>, %arg1: memref<128x512xf32, #tpu.memory_space<vmem>>, %arg2: memref<128x512xf32, #tpu.memory_space<vmem>>, %arg3: memref<128x128xf32, #tpu.memory_space<vmem>>, %arg4: memref<1x128xf32, #tpu.memory_space<vmem>>, %arg5: memref<8x128xf32, #tpu.memory_space<vmem>>, %arg6: memref<64x512xf32, #tpu.memory_space<vmem>>) attributes {dimension_semantics = [], scalar_prefetch = 0 : i64, scratch_operands = 1 : i64, tpu.core_type = #tpu.core_type<tc>} {
    %c0 = arith.constant 0 : index
    %c0_0 = arith.constant 0 : index
    %0 = vector.load %arg0[%c0, %c0_0] : memref<64x1xi32, #tpu.memory_space<vmem>>, vector<64x1xi32>
    %1 = tpu.iota {dimensions = array<i32: 1>} : vector<64x128xi32>
    %2 = vector.broadcast %0 : vector<64x1xi32> to vector<64x128xi32>
    %3 = arith.cmpi eq, %2, %1 : vector<64x128xi32>
    %4 = arith.extui %3 : vector<64x128xi1> to vector<64x128xi32>
    %5 = arith.sitofp %4 : vector<64x128xi32> to vector<64x128xf32>
    %c0_1 = arith.constant 0 : index
    %c0_2 = arith.constant 0 : index
    %6 = vector.load %arg1[%c0_1, %c0_2] : memref<128x512xf32, #tpu.memory_space<vmem>>, vector<128x512xf32>
    %cst = arith.constant dense<0.000000e+00> : vector<64x512xf32>
    %7 = tpu.matmul %5, %6, %cst {dimension_numbers = #tpu.dot_dimension_numbers<[1], [0], [0], [1], [0, 0, 1, 1], [], []>} : vector<64x128xf32>, vector<128x512xf32>, vector<64x512xf32> -> vector<64x512xf32>
    %c0_3 = arith.constant 0 : index
    %c0_4 = arith.constant 0 : index
    %8 = vector.load %arg6[%c0_3, %c0_4] : memref<64x512xf32, #tpu.memory_space<vmem>>, vector<64x512xf32>
    tpu.vector_store %arg6[%c0_3, %c0_4], %7 {strides = array<i32>} : memref<64x512xf32, #tpu.memory_space<vmem>>, vector<64x512xf32>,
    %c0_5 = arith.constant 0 : index
    %c0_6 = arith.constant 0 : index
    %9 = vector.load %arg6[%c0_5, %c0_6] : memref<64x512xf32, #tpu.memory_space<vmem>>, vector<8x512xf32>
    %10 = vector.extract_strided_slice %9 {offsets = [0, 0], sizes = [8, 384], strides = [1, 1]} : vector<8x512xf32> to vector<8x384xf32>
    %11 = arith.negf %10 : vector<8x384xf32>
    %12 = math.exp %11 : vector<8x384xf32>
    %cst_7 = arith.constant 1.000000e+00 : f32
    %13 = vector.broadcast %cst_7 : f32 to vector<8x384xf32>
    %14 = arith.addf %13, %12 : vector<8x384xf32>
    %15 = arith.divf %13, %14 : vector<8x384xf32>
    %16 = vector.extract_strided_slice %15 {offsets = [0, 0], sizes = [8, 128], strides = [1, 1]} : vector<8x384xf32> to vector<8x128xf32>
    %17 = vector.extract_strided_slice %15 {offsets = [0, 256], sizes = [8, 128], strides = [1, 1]} : vector<8x384xf32> to vector<8x128xf32>
    %18 = vector.extract_strided_slice %9 {offsets = [0, 384], sizes = [8, 128], strides = [1, 1]} : vector<8x512xf32> to vector<8x128xf32>
    %19 = math.tanh %18 : vector<8x128xf32>
    %20 = arith.mulf %16, %19 : vector<8x128xf32>
    %21 = math.tanh %20 : vector<8x128xf32>
    %22 = arith.mulf %17, %21 : vector<8x128xf32>
    %c8 = arith.constant 8 : index
    %c0_8 = arith.constant 0 : index
    %23 = vector.load %arg6[%c8, %c0_8] : memref<64x512xf32, #tpu.memory_space<vmem>>, vector<8x512xf32>
    %c0_9 = arith.constant 0 : index
    %c0_10 = arith.constant 0 : index
    %24 = vector.load %arg2[%c0_9, %c0_10] : memref<128x512xf32, #tpu.memory_space<vmem>>, vector<128x512xf32>
    %cst_11 = arith.constant dense<0.000000e+00> : vector<8x512xf32>
    %25 = tpu.matmul %22, %24, %cst_11 {dimension_numbers = #tpu.dot_dimension_numbers<[1], [0], [0], [1], [0, 0, 1, 1], [], []>} : vector<8x128xf32>, vector<128x512xf32>, vector<8x512xf32> -> vector<8x512xf32>
    %26 = arith.addf %23, %25 : vector<8x512xf32>
    %27 = vector.extract_strided_slice %26 {offsets = [0, 0], sizes = [8, 384], strides = [1, 1]} : vector<8x512xf32> to vector<8x384xf32>
    %28 = arith.negf %27 : vector<8x384xf32>
    %29 = math.exp %28 : vector<8x384xf32>
    %cst_12 = arith.constant 1.000000e+00 : f32
    %30 = vector.broadcast %cst_12 : f32 to vector<8x384xf32>
    %31 = arith.addf %30, %29 : vector<8x384xf32>
    %32 = arith.divf %30, %31 : vector<8x384xf32>
    %33 = vector.extract_strided_slice %32 {offsets = [0, 0], sizes = [8, 128], strides = [1, 1]} : vector<8x384xf32> to vector<8x128xf32>
    %34 = vector.extract_strided_slice %32 {offsets = [0, 128], sizes = [8, 128], strides = [1, 1]} : vector<8x384xf32> to vector<8x128xf32>
    %35 = vector.extract_strided_slice %32 {offsets = [0, 256], sizes = [8, 128], strides = [1, 1]} : vector<8x384xf32> to vector<8x128xf32>
    %36 = vector.extract_strided_slice %26 {offsets = [0, 384], sizes = [8, 128], strides = [1, 1]} : vector<8x512xf32> to vector<8x128xf32>
    %37 = math.tanh %36 : vector<8x128xf32>
    %38 = arith.mulf %34, %20 : vector<8x128xf32>
    %39 = arith.mulf %33, %37 : vector<8x128xf32>
    %40 = arith.addf %38, %39 : vector<8x128xf32>
    %41 = math.tanh %40 : vector<8x128xf32>
    %42 = arith.mulf %35, %41 : vector<8x128xf32>
    %c16 = arith.constant 16 : index
    %c0_13 = arith.constant 0 : index
    %43 = vector.load %arg6[%c16, %c0_13] : memref<64x512xf32, #tpu.memory_space<vmem>>, vector<8x512xf32>
    %c0_14 = arith.constant 0 : index
    %c0_15 = arith.constant 0 : index
    %44 = vector.load %arg2[%c0_14, %c0_15] : memref<128x512xf32, #tpu.memory_space<vmem>>, vector<128x512xf32>
    %cst_16 = arith.constant dense<0.000000e+00> : vector<8x512xf32>
    %45 = tpu.matmul %42, %44, %cst_16 {dimension_numbers = #tpu.dot_dimension_numbers<[1], [0], [0], [1], [0, 0, 1, 1], [], []>} : vector<8x128xf32>, vector<128x512xf32>, vector<8x512xf32> -> vector<8x512xf32>
    %46 = arith.addf %43, %45 : vector<8x512xf32>
    %47 = vector.extract_strided_slice %46 {offsets = [0, 0], sizes = [8, 384], strides = [1, 1]} : vector<8x512xf32> to vector<8x384xf32>
    %48 = arith.negf %47 : vector<8x384xf32>
    %49 = math.exp %48 : vector<8x384xf32>
    %cst_17 = arith.constant 1.000000e+00 : f32
    %50 = vector.broadcast %cst_17 : f32 to vector<8x384xf32>
    %51 = arith.addf %50, %49 : vector<8x384xf32>
    %52 = arith.divf %50, %51 : vector<8x384xf32>
    %53 = vector.extract_strided_slice %52 {offsets = [0, 0], sizes = [8, 128], strides = [1, 1]} : vector<8x384xf32> to vector<8x128xf32>
    %54 = vector.extract_strided_slice %52 {offsets = [0, 128], sizes = [8, 128], strides = [1, 1]} : vector<8x384xf32> to vector<8x128xf32>
    %55 = vector.extract_strided_slice %52 {offsets = [0, 256], sizes = [8, 128], strides = [1, 1]} : vector<8x384xf32> to vector<8x128xf32>
    %56 = vector.extract_strided_slice %46 {offsets = [0, 384], sizes = [8, 128], strides = [1, 1]} : vector<8x512xf32> to vector<8x128xf32>
    %57 = math.tanh %56 : vector<8x128xf32>
    %58 = arith.mulf %54, %40 : vector<8x128xf32>
    %59 = arith.mulf %53, %57 : vector<8x128xf32>
    %60 = arith.addf %58, %59 : vector<8x128xf32>
    %61 = math.tanh %60 : vector<8x128xf32>
    %62 = arith.mulf %55, %61 : vector<8x128xf32>
    %c24 = arith.constant 24 : index
    %c0_18 = arith.constant 0 : index
    %63 = vector.load %arg6[%c24, %c0_18] : memref<64x512xf32, #tpu.memory_space<vmem>>, vector<8x512xf32>
    %c0_19 = arith.constant 0 : index
    %c0_20 = arith.constant 0 : index
    %64 = vector.load %arg2[%c0_19, %c0_20] : memref<128x512xf32, #tpu.memory_space<vmem>>, vector<128x512xf32>
    %cst_21 = arith.constant dense<0.000000e+00> : vector<8x512xf32>
    %65 = tpu.matmul %62, %64, %cst_21 {dimension_numbers = #tpu.dot_dimension_numbers<[1], [0], [0], [1], [0, 0, 1, 1], [], []>} : vector<8x128xf32>, vector<128x512xf32>, vector<8x512xf32> -> vector<8x512xf32>
    %66 = arith.addf %63, %65 : vector<8x512xf32>
    %67 = vector.extract_strided_slice %66 {offsets = [0, 0], sizes = [8, 384], strides = [1, 1]} : vector<8x512xf32> to vector<8x384xf32>
    %68 = arith.negf %67 : vector<8x384xf32>
    %69 = math.exp %68 : vector<8x384xf32>
    %cst_22 = arith.constant 1.000000e+00 : f32
    %70 = vector.broadcast %cst_22 : f32 to vector<8x384xf32>
    %71 = arith.addf %70, %69 : vector<8x384xf32>
    %72 = arith.divf %70, %71 : vector<8x384xf32>
    %73 = vector.extract_strided_slice %72 {offsets = [0, 0], sizes = [8, 128], strides = [1, 1]} : vector<8x384xf32> to vector<8x128xf32>
    %74 = vector.extract_strided_slice %72 {offsets = [0, 128], sizes = [8, 128], strides = [1, 1]} : vector<8x384xf32> to vector<8x128xf32>
    %75 = vector.extract_strided_slice %72 {offsets = [0, 256], sizes = [8, 128], strides = [1, 1]} : vector<8x384xf32> to vector<8x128xf32>
    %76 = vector.extract_strided_slice %66 {offsets = [0, 384], sizes = [8, 128], strides = [1, 1]} : vector<8x512xf32> to vector<8x128xf32>
    %77 = math.tanh %76 : vector<8x128xf32>
    %78 = arith.mulf %74, %60 : vector<8x128xf32>
    %79 = arith.mulf %73, %77 : vector<8x128xf32>
    %80 = arith.addf %78, %79 : vector<8x128xf32>
    %81 = math.tanh %80 : vector<8x128xf32>
    %82 = arith.mulf %75, %81 : vector<8x128xf32>
    %c32 = arith.constant 32 : index
    %c0_23 = arith.constant 0 : index
    %83 = vector.load %arg6[%c32, %c0_23] : memref<64x512xf32, #tpu.memory_space<vmem>>, vector<8x512xf32>
    %c0_24 = arith.constant 0 : index
    %c0_25 = arith.constant 0 : index
    %84 = vector.load %arg2[%c0_24, %c0_25] : memref<128x512xf32, #tpu.memory_space<vmem>>, vector<128x512xf32>
    %cst_26 = arith.constant dense<0.000000e+00> : vector<8x512xf32>
    %85 = tpu.matmul %82, %84, %cst_26 {dimension_numbers = #tpu.dot_dimension_numbers<[1], [0], [0], [1], [0, 0, 1, 1], [], []>} : vector<8x128xf32>, vector<128x512xf32>, vector<8x512xf32> -> vector<8x512xf32>
    %86 = arith.addf %83, %85 : vector<8x512xf32>
    %87 = vector.extract_strided_slice %86 {offsets = [0, 0], sizes = [8, 384], strides = [1, 1]} : vector<8x512xf32> to vector<8x384xf32>
    %88 = arith.negf %87 : vector<8x384xf32>
    %89 = math.exp %88 : vector<8x384xf32>
    %cst_27 = arith.constant 1.000000e+00 : f32
    %90 = vector.broadcast %cst_27 : f32 to vector<8x384xf32>
    %91 = arith.addf %90, %89 : vector<8x384xf32>
    %92 = arith.divf %90, %91 : vector<8x384xf32>
    %93 = vector.extract_strided_slice %92 {offsets = [0, 0], sizes = [8, 128], strides = [1, 1]} : vector<8x384xf32> to vector<8x128xf32>
    %94 = vector.extract_strided_slice %92 {offsets = [0, 128], sizes = [8, 128], strides = [1, 1]} : vector<8x384xf32> to vector<8x128xf32>
    %95 = vector.extract_strided_slice %92 {offsets = [0, 256], sizes = [8, 128], strides = [1, 1]} : vector<8x384xf32> to vector<8x128xf32>
    %96 = vector.extract_strided_slice %86 {offsets = [0, 384], sizes = [8, 128], strides = [1, 1]} : vector<8x512xf32> to vector<8x128xf32>
    %97 = math.tanh %96 : vector<8x128xf32>
    %98 = arith.mulf %94, %80 : vector<8x128xf32>
    %99 = arith.mulf %93, %97 : vector<8x128xf32>
    %100 = arith.addf %98, %99 : vector<8x128xf32>
    %101 = math.tanh %100 : vector<8x128xf32>
    %102 = arith.mulf %95, %101 : vector<8x128xf32>
    %c40 = arith.constant 40 : index
    %c0_28 = arith.constant 0 : index
    %103 = vector.load %arg6[%c40, %c0_28] : memref<64x512xf32, #tpu.memory_space<vmem>>, vector<8x512xf32>
    %c0_29 = arith.constant 0 : index
    %c0_30 = arith.constant 0 : index
    %104 = vector.load %arg2[%c0_29, %c0_30] : memref<128x512xf32, #tpu.memory_space<vmem>>, vector<128x512xf32>
    %cst_31 = arith.constant dense<0.000000e+00> : vector<8x512xf32>
    %105 = tpu.matmul %102, %104, %cst_31 {dimension_numbers = #tpu.dot_dimension_numbers<[1], [0], [0], [1], [0, 0, 1, 1], [], []>} : vector<8x128xf32>, vector<128x512xf32>, vector<8x512xf32> -> vector<8x512xf32>
    %106 = arith.addf %103, %105 : vector<8x512xf32>
    %107 = vector.extract_strided_slice %106 {offsets = [0, 0], sizes = [8, 384], strides = [1, 1]} : vector<8x512xf32> to vector<8x384xf32>
    %108 = arith.negf %107 : vector<8x384xf32>
    %109 = math.exp %108 : vector<8x384xf32>
    %cst_32 = arith.constant 1.000000e+00 : f32
    %110 = vector.broadcast %cst_32 : f32 to vector<8x384xf32>
    %111 = arith.addf %110, %109 : vector<8x384xf32>
    %112 = arith.divf %110, %111 : vector<8x384xf32>
    %113 = vector.extract_strided_slice %112 {offsets = [0, 0], sizes = [8, 128], strides = [1, 1]} : vector<8x384xf32> to vector<8x128xf32>
    %114 = vector.extract_strided_slice %112 {offsets = [0, 128], sizes = [8, 128], strides = [1, 1]} : vector<8x384xf32> to vector<8x128xf32>
    %115 = vector.extract_strided_slice %112 {offsets = [0, 256], sizes = [8, 128], strides = [1, 1]} : vector<8x384xf32> to vector<8x128xf32>
    %116 = vector.extract_strided_slice %106 {offsets = [0, 384], sizes = [8, 128], strides = [1, 1]} : vector<8x512xf32> to vector<8x128xf32>
    %117 = math.tanh %116 : vector<8x128xf32>
    %118 = arith.mulf %114, %100 : vector<8x128xf32>
    %119 = arith.mulf %113, %117 : vector<8x128xf32>
    %120 = arith.addf %118, %119 : vector<8x128xf32>
    %121 = math.tanh %120 : vector<8x128xf32>
    %122 = arith.mulf %115, %121 : vector<8x128xf32>
    %c48 = arith.constant 48 : index
    %c0_33 = arith.constant 0 : index
    %123 = vector.load %arg6[%c48, %c0_33] : memref<64x512xf32, #tpu.memory_space<vmem>>, vector<8x512xf32>
    %c0_34 = arith.constant 0 : index
    %c0_35 = arith.constant 0 : index
    %124 = vector.load %arg2[%c0_34, %c0_35] : memref<128x512xf32, #tpu.memory_space<vmem>>, vector<128x512xf32>
    %cst_36 = arith.constant dense<0.000000e+00> : vector<8x512xf32>
    %125 = tpu.matmul %122, %124, %cst_36 {dimension_numbers = #tpu.dot_dimension_numbers<[1], [0], [0], [1], [0, 0, 1, 1], [], []>} : vector<8x128xf32>, vector<128x512xf32>, vector<8x512xf32> -> vector<8x512xf32>
    %126 = arith.addf %123, %125 : vector<8x512xf32>
    %127 = vector.extract_strided_slice %126 {offsets = [0, 0], sizes = [8, 384], strides = [1, 1]} : vector<8x512xf32> to vector<8x384xf32>
    %128 = arith.negf %127 : vector<8x384xf32>
    %129 = math.exp %128 : vector<8x384xf32>
    %cst_37 = arith.constant 1.000000e+00 : f32
    %130 = vector.broadcast %cst_37 : f32 to vector<8x384xf32>
    %131 = arith.addf %130, %129 : vector<8x384xf32>
    %132 = arith.divf %130, %131 : vector<8x384xf32>
    %133 = vector.extract_strided_slice %132 {offsets = [0, 0], sizes = [8, 128], strides = [1, 1]} : vector<8x384xf32> to vector<8x128xf32>
    %134 = vector.extract_strided_slice %132 {offsets = [0, 128], sizes = [8, 128], strides = [1, 1]} : vector<8x384xf32> to vector<8x128xf32>
    %135 = vector.extract_strided_slice %132 {offsets = [0, 256], sizes = [8, 128], strides = [1, 1]} : vector<8x384xf32> to vector<8x128xf32>
    %136 = vector.extract_strided_slice %126 {offsets = [0, 384], sizes = [8, 128], strides = [1, 1]} : vector<8x512xf32> to vector<8x128xf32>
    %137 = math.tanh %136 : vector<8x128xf32>
    %138 = arith.mulf %134, %120 : vector<8x128xf32>
    %139 = arith.mulf %133, %137 : vector<8x128xf32>
    %140 = arith.addf %138, %139 : vector<8x128xf32>
    %141 = math.tanh %140 : vector<8x128xf32>
    %142 = arith.mulf %135, %141 : vector<8x128xf32>
    %c56 = arith.constant 56 : index
    %c0_38 = arith.constant 0 : index
    %143 = vector.load %arg6[%c56, %c0_38] : memref<64x512xf32, #tpu.memory_space<vmem>>, vector<8x512xf32>
    %c0_39 = arith.constant 0 : index
    %c0_40 = arith.constant 0 : index
    %144 = vector.load %arg2[%c0_39, %c0_40] : memref<128x512xf32, #tpu.memory_space<vmem>>, vector<128x512xf32>
    %cst_41 = arith.constant dense<0.000000e+00> : vector<8x512xf32>
    %145 = tpu.matmul %142, %144, %cst_41 {dimension_numbers = #tpu.dot_dimension_numbers<[1], [0], [0], [1], [0, 0, 1, 1], [], []>} : vector<8x128xf32>, vector<128x512xf32>, vector<8x512xf32> -> vector<8x512xf32>
    %146 = arith.addf %143, %145 : vector<8x512xf32>
    %147 = vector.extract_strided_slice %146 {offsets = [0, 0], sizes = [8, 384], strides = [1, 1]} : vector<8x512xf32> to vector<8x384xf32>
    %148 = arith.negf %147 : vector<8x384xf32>
    %149 = math.exp %148 : vector<8x384xf32>
    %cst_42 = arith.constant 1.000000e+00 : f32
    %150 = vector.broadcast %cst_42 : f32 to vector<8x384xf32>
    %151 = arith.addf %150, %149 : vector<8x384xf32>
    %152 = arith.divf %150, %151 : vector<8x384xf32>
    %153 = vector.extract_strided_slice %152 {offsets = [0, 0], sizes = [8, 128], strides = [1, 1]} : vector<8x384xf32> to vector<8x128xf32>
    %154 = vector.extract_strided_slice %152 {offsets = [0, 128], sizes = [8, 128], strides = [1, 1]} : vector<8x384xf32> to vector<8x128xf32>
    %155 = vector.extract_strided_slice %152 {offsets = [0, 256], sizes = [8, 128], strides = [1, 1]} : vector<8x384xf32> to vector<8x128xf32>
    %156 = vector.extract_strided_slice %146 {offsets = [0, 384], sizes = [8, 128], strides = [1, 1]} : vector<8x512xf32> to vector<8x128xf32>
    %157 = math.tanh %156 : vector<8x128xf32>
    %158 = arith.mulf %154, %140 : vector<8x128xf32>
    %159 = arith.mulf %153, %157 : vector<8x128xf32>
    %160 = arith.addf %158, %159 : vector<8x128xf32>
    %161 = math.tanh %160 : vector<8x128xf32>
    %162 = arith.mulf %155, %161 : vector<8x128xf32>
    %c0_43 = arith.constant 0 : index
    %c0_44 = arith.constant 0 : index
    %163 = vector.load %arg3[%c0_43, %c0_44] : memref<128x128xf32, #tpu.memory_space<vmem>>, vector<128x128xf32>
    %cst_45 = arith.constant dense<0.000000e+00> : vector<8x128xf32>
    %164 = tpu.matmul %162, %163, %cst_45 {dimension_numbers = #tpu.dot_dimension_numbers<[1], [0], [0], [1], [0, 0, 1, 1], [], []>} : vector<8x128xf32>, vector<128x128xf32>, vector<8x128xf32> -> vector<8x128xf32>
    %c0_46 = arith.constant 0 : index
    %c0_47 = arith.constant 0 : index
    %165 = vector.load %arg4[%c0_46, %c0_47] : memref<1x128xf32, #tpu.memory_space<vmem>>, vector<1x128xf32>
    %166 = vector.broadcast %165 : vector<1x128xf32> to vector<8x128xf32>
    %167 = arith.addf %164, %166 : vector<8x128xf32>
    %c0_48 = arith.constant 0 : index
    %c0_49 = arith.constant 0 : index
    %168 = vector.load %arg5[%c0_48, %c0_49] : memref<8x128xf32, #tpu.memory_space<vmem>>, vector<8x128xf32>
    tpu.vector_store %arg5[%c0_48, %c0_49], %167 {strides = array<i32>} : memref<8x128xf32, #tpu.memory_space<vmem>>, vector<8x128xf32>,
    return
  }
}

</mosaic_0001>

<bundles_post_ra>
// kernel: _forward_jit.1
= control target key start
LH: loop header
LB: loop body
LE: loop exit
PB: predicated region body
PF: predicated region fallthrough
CT: control target
= control target key end

     0   :  { %10 = vsyncpa [#allocation4], 0  ;;  %s3202_s0 = inlined_call_operand.vmem [shape: s32[64,1], index: 0, kind: input, shape index: {}]   ;;  %s3203_s1 = inlined_call_operand.hbm [shape: f32[128,512], index: 1, kind: input, shape index: {}]   ;;  %s3204_s2 = inlined_call_operand.hbm [shape: f32[128,512], index: 2, kind: input, shape index: {}]   ;;  %s3205_s3 = inlined_call_operand.hbm [shape: f32[128,128], index: 3, kind: input, shape index: {}]   ;;  %s3206_s4 = inlined_call_operand.vmem [shape: f32[1,128], index: 4, kind: input, shape index: {}]   ;;  %s3207_s5 = inlined_call_operand.vmem [shape: f32[8,128], index: 5, kind: output, shape index: {}]  }
   0x1   :  { %11 = vsyncpa [#allocation6], 0  ;;  %s2714_s18 = smov [#allocation5]   ;;  %s2715_s20 = smov [#allocation3]  }
   0x2   :  { %s31_s19 = sshll.u32 %s2714_s18, 4  ;;  %s19_s21 = sshll.u32 %s2715_s20, 4  ;;  %s32_s19 = int_to_ptr.vmem [resolvable:$true] %s31_s19  ;;  %s2756_s21 = int_to_ptr.vmem [resolvable:$true] %s19_s21 }
   0x3   :  { %s2644_s24 = scalar_lea.hbm %s3204_s2, 8192 }
   0x4   :  { %p2645_p0 = scmp.ne.s32.totalorder %s3204_s2, %s2644_s24  ;;  %p2648_p1 = scmp.lt.u32.totalorder %s2644_s24, %s3204_s2 }
   0x6   :  { %p2650_p2 = pnand %p2648_p1, %p2645_p0 }
   0x8   :  { %2653 = shalt.err (!%p2650_p2)
}
   0x9   :  { %s2654_s29 = scalar_lea.vmem %s32_s19, 8192  ;;  %p2659_p4 = scmp.lt.s32.totalorder %s32_s19, %s32_s19 }
   0xa   :  { %p2655_p3 = scmp.ne.s32.totalorder %s32_s19, %s2654_s29  ;;  %p2660_p5 = scmp.lt.s32.totalorder %s2654_s29, %s2654_s29 }
   0xc   :  { %p2661_p6 = por %p2660_p5, %p2659_p4 }
   0xe   :  { %p2662_p7 = pnand %p2661_p6, %p2655_p3 }
  0x10   :  { %2665 = shalt.err (!%p2662_p7)
}
  0x11   :  { %s2716_s30 = smov 512   ;;  %s2717_s6 = smov 32  }
  0x12   :  { %37 = dma.hbm_to_vmem [thread:$0]  %s3204_s2, 8192, %s32_s19, [#allocation6], %s2716_s30, %s2716_s30, %s2717_s6  }
  0x13   :  { %s2666_s11 = scalar_lea.hbm %s3203_s1, 8192 }
  0x14   :  { %p2667_p8 = scmp.ne.s32.totalorder %s3203_s1, %s2666_s11  ;;  %p2670_p9 = scmp.lt.u32.totalorder %s2666_s11, %s3203_s1 }
  0x16   :  { %p2672_p10 = pnand %p2670_p9, %p2667_p8 }
  0x18   :  { %2675 = shalt.err (!%p2672_p10)
}
  0x19   :  { %s2676_s16 = scalar_lea.vmem %s2756_s21, 8192  ;;  %p2681_p12 = scmp.lt.s32.totalorder %s2756_s21, %s2756_s21 }
  0x1a   :  { %p2677_p11 = scmp.ne.s32.totalorder %s2756_s21, %s2676_s16  ;;  %p2682_p13 = scmp.lt.s32.totalorder %s2676_s16, %s2676_s16 }
  0x1c   :  { %p2683_p0 = por %p2682_p13, %p2681_p12 }
  0x1e   :  { %p2684_p1 = pnand %p2683_p0, %p2677_p11 }
  0x20   :  { %2687 = shalt.err (!%p2684_p1)
}
  0x21   :  { %25 = dma.hbm_to_vmem [thread:$0]  %s3203_s1, 8192, %s2756_s21, [#allocation4], %s2716_s30, %s2716_s30, %s2717_s6  }
  0x22   :  { %s2718_s18 = smov [#allocation7]   ;;  %s2688_s23 = scalar_lea.hbm %s3205_s3, 2048 }
  0x23   :  { %s43_s19 = sshll.u32 %s2718_s18, 4  ;;  %p2689_p2 = scmp.ne.s32.totalorder %s3205_s3, %s2688_s23  ;;  %s44_s19 = int_to_ptr.vmem [resolvable:$true] %s43_s19 }
  0x24   :  { %p2692_p3 = scmp.lt.u32.totalorder %s2688_s23, %s3205_s3 }
  0x26   :  { %p2694_p4 = pnand %p2692_p3, %p2689_p2 }
  0x28   :  { %2697 = shalt.err (!%p2694_p4)
}
  0x29   :  { %s2698_s28 = scalar_lea.vmem %s44_s19, 2048  ;;  %p2703_p6 = scmp.lt.s32.totalorder %s44_s19, %s44_s19 }
  0x2a   :  { %p2699_p5 = scmp.ne.s32.totalorder %s44_s19, %s2698_s28  ;;  %p2704_p7 = scmp.lt.s32.totalorder %s2698_s28, %s2698_s28 }
  0x2c   :  { %p2705_p8 = por %p2704_p7, %p2703_p6 }
  0x2e   :  { %p2706_p9 = pnand %p2705_p8, %p2699_p5 }
  0x30   :  { %2709 = shalt.err (!%p2706_p9)
}
  0x31   :  { %s2719_s1 = smov 128   ;;  %s2720_s21 = smov 8  }
  0x32   :  { %49 = dma.hbm_to_vmem [thread:$0]  %s3205_s3, 2048, %s44_s19, [#allocation6], %s2719_s1, %s2719_s1, %s2720_s21  }
  0x33   :  { %2710 = dma.done.wait [#allocation4], 8192  }
  0x34   :  { %2711 = vsyncadd [#allocation4], 4294959104 }
  0x35   :  { %2712 = dma.done.wait [#allocation6], 10240  }
  0x36   :  { %2713 = vsyncadd [#allocation6], 4294957056  ;;  %v2721_v0 = vmov 0   ;;  %v61_v1 = vld [vmem:[%s3202_s0] sm:$0xff]  ;;  %v63_v2 = vld [vmem:[%s3202_s0 + $0x10] sm:$0xff]  ;;  %v2722_v7 = vmov 0.0  }
  0x37   :  { %2518 = vset.pattern.permute.xlu0 %v2721_v0  ;;  %2519 = vset.pattern.permute.xlu1 %v2721_v0  ;;  %v62_v3 = vld [vmem:[%s3202_s0 + $0x8] sm:$0xff]  ;;  %v64_v4 = vld [vmem:[%s3202_s0 + $0x18] sm:$0xff]  ;;  %v119_v11 = vld [vmem:[#allocation3] sm:$0xff]  ;;  %vm2725_vm8 = vmmov 0  }
  0x38   :  { %72 = vperm.xlu0 %2518, %v61_v1   ;;  %78 = vperm.xlu1 %2519, %v63_v2   ;;  %v120_v5 = vld [vmem:[#allocation3 + $0x8] sm:$0xff]  ;;  %v122_v9 = vld [vmem:[#allocation3 + $0x18] sm:$0xff]  ;;  %v65_v12 = vld [vmem:[%s3202_s0 + $0x20] sm:$0xff] }
  0x39   :  { %v124_v6 = vld [vmem:[#allocation3 + $0x28] sm:$0xff]  ;;  %247 = vmatprep.mubr.f32.mxu0 %v2722_v7  ;;  %360 = vmatprep.mubr.f32.mxu1 %v2722_v7  ;;  %v126_v10 = vld [vmem:[#allocation3 + $0x38] sm:$0xff]  ;;  %v123_v15 = vld [vmem:[#allocation3 + $0x20] sm:$0xff] }
  0x3a   :  { %v1942_v8 = vpack.c.bf16 %v124_v6, %v120_v5  ;;  %v66_v13 = vld [vmem:[%s3202_s0 + $0x28] sm:$0xff]  ;;  %v1974_v14 = vpack.c.bf16 %v126_v10, %v122_v9  ;;  %v121_v16 = vld [vmem:[#allocation3 + $0x10] sm:$0xff]  ;;  %v1944_v18 = vpack.c.bf16 %v123_v15, %v119_v11  ;;  %v130_v22 = vld [vmem:[#allocation3 + $0x58] sm:$0xff] }
  0x3b   :  { %v125_v17 = vld [vmem:[#allocation3 + $0x30] sm:$0xff]  ;;  %v128_v20 = vld [vmem:[#allocation3 + $0x48] sm:$0xff]  ;;  %v134_v24 = vld [vmem:[#allocation3 + $0x78] sm:$0xff] }
  0x3c   :  { %75 = vperm.xlu0 %2518, %v62_v3   ;;  %81 = vperm.xlu1 %2519, %v64_v4   ;;  %v1976_v19 = vpack.c.bf16 %v125_v17, %v121_v16  ;;  %v132_v21 = vld [vmem:[#allocation3 + $0x68] sm:$0xff]  ;;  %v127_v25 = vld [vmem:[#allocation3 + $0x40] sm:$0xff]  ;;  %v1978_v27 = vpack.c.bf16 %v134_v24, %v130_v22  ;;  %v129_v29 = vld [vmem:[#allocation3 + $0x50] sm:$0xff] }
  0x3d   :  { %1943 = vmatprep.subr.bf16.mxu0 %v1942_v8  ;;  %1975 = vmatprep.subr.bf16.mxu1 %v1974_v14  ;;  %v1946_v23 = vpack.c.bf16 %v132_v21, %v128_v20  ;;  %v131_v26 = vld [vmem:[#allocation3 + $0x60] sm:$0xff]  ;;  %v133_v30 = vld [vmem:[#allocation3 + $0x70] sm:$0xff]  ;;  %v136_v31 = vld [vmem:[#allocation3 + $0x88] sm:$0xff] }
  0x3e   :  { %1945 = vmatpush1.bf16.msra.mxu0 %v1944_v18  ;;  %1977 = vmatpush1.bf16.msra.mxu1 %v1976_v19  ;;  %v1948_v28 = vpack.c.bf16 %v131_v26, %v127_v25  ;;  %v67_v32 = vld [vmem:[%s3202_s0 + $0x30] sm:$0xff]  ;;  %v1980_v33 = vpack.c.bf16 %v133_v30, %v129_v29  ;;  %v140_v34 = vld [vmem:[#allocation3 + $0xa8] sm:$0xff]  ;;  %v138_v35 = vld [vmem:[#allocation3 + $0x98] sm:$0xff] }
  0x3f   :  { %1947 = vmatprep.subr.bf16.mxu0 %v1946_v23  ;;  %v142_v36 = vld [vmem:[#allocation3 + $0xb8] sm:$0xff]  ;;  %v1950_v37 = vpack.c.bf16 %v140_v34, %v136_v31  ;;  %v135_v39 = vld [vmem:[#allocation3 + $0x80] sm:$0xff]  ;;  %v137_v41 = vld [vmem:[#allocation3 + $0x90] sm:$0xff]  ;;  %1979 = vmatprep.subr.bf16.mxu1 %v1978_v27 }
  0x40   :  { %84 = vperm.xlu0 %2518, %v65_v12   ;;  %87 = vperm.xlu1 %2519, %v66_v13   ;;  %v1982_v38 = vpack.c.bf16 %v142_v36, %v138_v35  ;;  %v139_v40 = vld [vmem:[#allocation3 + $0xa0] sm:$0xff]  ;;  %v141_v42 = vld [vmem:[#allocation3 + $0xb0] sm:$0xff]  ;;  %v144_v43 = vld [vmem:[#allocation3 + $0xc8] sm:$0xff] }
  0x41   :  { %v148_v44 = vld [vmem:[#allocation3 + $0xe8] sm:$0xff]  ;;  %v1952_v45 = vpack.c.bf16 %v139_v40, %v135_v39  ;;  %v1984_v46 = vpack.c.bf16 %v141_v42, %v137_v41  ;;  %v146_v47 = vld [vmem:[#allocation3 + $0xd8] sm:$0xff]  ;;  %v143_v49 = vld [vmem:[#allocation3 + $0xc0] sm:$0xff] }
  0x42   :  { %1949 = vmatpush1.bf16.msra.mxu0 %v1948_v28  ;;  %1981 = vmatpush1.bf16.msra.mxu1 %v1980_v33  ;;  %v150_v48 = vld [vmem:[#allocation3 + $0xf8] sm:$0xff]  ;;  %v1954_v50 = vpack.c.bf16 %v148_v44, %v144_v43  ;;  %v147_v52 = vld [vmem:[#allocation3 + $0xe0] sm:$0xff]  ;;  %v145_v53 = vld [vmem:[#allocation3 + $0xd0] sm:$0xff]  ;;  %v69_v43 = vlaneseq }
  0x43   :  { %1951 = vmatprep.subr.bf16.mxu0 %v1950_v37  ;;  %1983 = vmatprep.subr.bf16.mxu1 %v1982_v38  ;;  %v1986_v51 = vpack.c.bf16 %v150_v48, %v146_v47  ;;  %v149_v54 = vld [vmem:[#allocation3 + $0xf0] sm:$0xff]  ;;  %v152_v55 = vld [vmem:[#allocation3 + $0x108] sm:$0xff]  ;;  %v154_v57 = vld [vmem:[#allocation3 + $0x118] sm:$0xff]  ;;  %v1956_v59 = vpack.c.bf16 %v147_v52, %v143_v49 }
  0x44   :  { %90 = vperm.xlu0 %2518, %v67_v32   ;;  %v156_v56 = vld [vmem:[#allocation3 + $0x128] sm:$0xff]  ;;  %v158_v58 = vld [vmem:[#allocation3 + $0x138] sm:$0xff]  ;;  %v1988_v60 = vpack.c.bf16 %v149_v54, %v145_v53  ;;  %v151_v61 = vld [vmem:[#allocation3 + $0x100] sm:$0xff]  ;;  %v2825_v44 = vand.u32 127, %v69_v43 }
  0x45   :  { %v155_v62 = vld [vmem:[#allocation3 + $0x120] sm:$0xff]  ;;  %v1958_v63 = vpack.c.bf16 %v156_v56, %v152_v55  ;;  %v1990_v0 = vpack.c.bf16 %v158_v58, %v154_v57  ;;  %v153_v1 = vld [vmem:[#allocation3 + $0x110] sm:$0xff]  ;;  %v160_v3 = vld [vmem:[#allocation3 + $0x148] sm:$0xff] }
  0x46   :  { %1953 = vmatpush1.bf16.msra.mxu0 %v1952_v45  ;;  %1985 = vmatpush1.bf16.msra.mxu1 %v1984_v46  ;;  %v157_v2 = vld [vmem:[#allocation3 + $0x130] sm:$0xff]  ;;  %v164_v4 = vld [vmem:[#allocation3 + $0x168] sm:$0xff]  ;;  %v162_v5 = vld [vmem:[#allocation3 + $0x158] sm:$0xff]  ;;  %v1960_v8 = vpack.c.bf16 %v155_v62, %v151_v61  ;;  %v2723_v46 = vmov 1.0  }
  0x47   :  { %1955 = vmatprep.subr.bf16.mxu0 %v1954_v50  ;;  %1987 = vmatprep.subr.bf16.mxu1 %v1986_v51  ;;  %v166_v6 = vld [vmem:[#allocation3 + $0x178] sm:$0xff]  ;;  %v1992_v9 = vpack.c.bf16 %v157_v2, %v153_v1  ;;  %v159_v10 = vld [vmem:[#allocation3 + $0x140] sm:$0xff]  ;;  %v1962_v12 = vpack.c.bf16 %v164_v4, %v160_v3  ;;  %v161_v14 = vld [vmem:[#allocation3 + $0x150] sm:$0xff] }
  0x48   :  { %v163_v11 = vld [vmem:[#allocation3 + $0x160] sm:$0xff]  ;;  %v1994_v13 = vpack.c.bf16 %v166_v6, %v162_v5  ;;  %v165_v15 = vld [vmem:[#allocation3 + $0x170] sm:$0xff]  ;;  %v168_v16 = vld [vmem:[#allocation3 + $0x188] sm:$0xff] }
  0x49   :  { %v172_v17 = vld [vmem:[#allocation3 + $0x1a8] sm:$0xff]  ;;  %v170_v18 = vld [vmem:[#allocation3 + $0x198] sm:$0xff]  ;;  %v1964_v20 = vpack.c.bf16 %v163_v11, %v159_v10  ;;  %v1996_v21 = vpack.c.bf16 %v165_v15, %v161_v14  ;;  %v167_v22 = vld [vmem:[#allocation3 + $0x180] sm:$0xff] }
  0x4a   :  { %1957 = vmatpush1.bf16.msra.mxu0 %v1956_v59  ;;  %1989 = vmatpush1.bf16.msra.mxu1 %v1988_v60  ;;  %v174_v19 = vld [vmem:[#allocation3 + $0x1b8] sm:$0xff]  ;;  %v171_v23 = vld [vmem:[#allocation3 + $0x1a0] sm:$0xff]  ;;  %v1966_v24 = vpack.c.bf16 %v172_v17, %v168_v16  ;;  %v169_v26 = vld [vmem:[#allocation3 + $0x190] sm:$0xff] }
  0x4b   :  { %1959 = vmatprep.subr.bf16.mxu0 %v1958_v63  ;;  %1991 = vmatprep.subr.bf16.mxu1 %v1990_v0  ;;  %v1998_v25 = vpack.c.bf16 %v174_v19, %v170_v18  ;;  %v173_v27 = vld [vmem:[#allocation3 + $0x1b0] sm:$0xff]  ;;  %v176_v28 = vld [vmem:[#allocation3 + $0x1c8] sm:$0xff]  ;;  %v178_v30 = vld [vmem:[#allocation3 + $0x1d8] sm:$0xff]  ;;  %v1968_v33 = vpack.c.bf16 %v171_v23, %v167_v22 }
  0x4c   :  { %v180_v29 = vld [vmem:[#allocation3 + $0x1e8] sm:$0xff]  ;;  %v182_v31 = vld [vmem:[#allocation3 + $0x1f8] sm:$0xff]  ;;  %v2000_v34 = vpack.c.bf16 %v173_v27, %v169_v26  ;;  %v175_v35 = vld [vmem:[#allocation3 + $0x1c0] sm:$0xff] }
  0x4d   :  { %v68_v32 = vld [vmem:[%s3202_s0 + $0x38] sm:$0xff]  ;;  %v1970_v36 = vpack.c.bf16 %v180_v29, %v176_v28  ;;  %v2002_v37 = vpack.c.bf16 %v182_v31, %v178_v30  ;;  %v179_v38 = vld [vmem:[#allocation3 + $0x1e0] sm:$0xff]  ;;  %v177_v39 = vld [vmem:[#allocation3 + $0x1d0] sm:$0xff] }
  0x4e   :  { %1961 = vmatpush1.bf16.msra.mxu0 %v1960_v8  ;;  %1993 = vmatpush1.bf16.msra.mxu1 %v1992_v9  ;;  %v181_v40 = vld [vmem:[#allocation3 + $0x1f0] sm:$0xff]  ;;  %v1972_v41 = vpack.c.bf16 %v179_v38, %v175_v35  ;;  %v465_v53 = vld [vmem:[#allocation5 + $0x8] sm:$0xff]  ;;  %v467_v55 = vld [vmem:[#allocation5 + $0x18] sm:$0xff] }
  0x4f   :  { %1963 = vmatprep.subr.bf16.mxu0 %v1962_v12  ;;  %1995 = vmatprep.subr.bf16.mxu1 %v1994_v13  ;;  %v2004_v42 = vpack.c.bf16 %v181_v40, %v177_v39  ;;  %v469_v54 = vld [vmem:[#allocation5 + $0x28] sm:$0xff]  ;;  %v464_v57 = vld [vmem:[#allocation5] sm:$0xff]  ;;  %v471_v59 = vld [vmem:[#allocation5 + $0x38] sm:$0xff] }
  0x50   :  { %93 = vperm.xlu1 %2519, %v68_v32   ;;  %v2862_v56 = vpack.c.bf16 %v469_v54, %v465_v53  ;;  %v468_v58 = vld [vmem:[#allocation5 + $0x20] sm:$0xff]  ;;  %v2866_v61 = vpack.c.bf16 %v471_v59, %v467_v55  ;;  %v466_v62 = vld [vmem:[#allocation5 + $0x10] sm:$0xff]  ;;  %v473_v1 = vld [vmem:[#allocation5 + $0x48] sm:$0xff] }
  0x51   :  { %v2864_v60 = vpack.c.bf16 %v468_v58, %v464_v57  ;;  %v470_v63 = vld [vmem:[#allocation5 + $0x30] sm:$0xff]  ;;  %v477_v2 = vld [vmem:[#allocation5 + $0x68] sm:$0xff]  ;;  %v475_v3 = vld [vmem:[#allocation5 + $0x58] sm:$0xff] }
  0x52   :  { %1965 = vmatpush1.bf16.msra.mxu0 %v1964_v20  ;;  %1997 = vmatpush1.bf16.msra.mxu1 %v1996_v21  ;;  %v2869_v0 = vpack.c.bf16 %v470_v63, %v466_v62  ;;  %v2874_v4 = vpack.c.bf16 %v477_v2, %v473_v1  ;;  %v472_v5 = vld [vmem:[#allocation5 + $0x40] sm:$0xff]  ;;  %v479_v8 = vld [vmem:[#allocation5 + $0x78] sm:$0xff]  ;;  %v474_v11 = vld [vmem:[#allocation5 + $0x50] sm:$0xff] }
  0x53   :  { %1967 = vmatprep.subr.bf16.mxu0 %v1966_v24  ;;  %1999 = vmatprep.subr.bf16.mxu1 %v1998_v25  ;;  %v476_v6 = vld [vmem:[#allocation5 + $0x60] sm:$0xff]  ;;  %v2878_v10 = vpack.c.bf16 %v479_v8, %v475_v3  ;;  %v478_v12 = vld [vmem:[#allocation5 + $0x70] sm:$0xff]  ;;  %v481_v14 = vld [vmem:[#allocation5 + $0x88] sm:$0xff] }
  0x54   :  { %v2876_v9 = vpack.c.bf16 %v476_v6, %v472_v5  ;;  %v2881_v13 = vpack.c.bf16 %v478_v12, %v474_v11  ;;  %v485_v15 = vld [vmem:[#allocation5 + $0xa8] sm:$0xff]  ;;  %v483_v16 = vld [vmem:[#allocation5 + $0x98] sm:$0xff]  ;;  %v480_v19 = vld [vmem:[#allocation5 + $0x80] sm:$0xff] }
  0x55   :  { %v2886_v18 = vpack.c.bf16 %v485_v15, %v481_v14  ;;  %v484_v20 = vld [vmem:[#allocation5 + $0xa0] sm:$0xff]  ;;  %v487_v21 = vld [vmem:[#allocation5 + $0xb8] sm:$0xff]  ;;  %v482_v24 = vld [vmem:[#allocation5 + $0x90] sm:$0xff] }
  0x56   :  { %1969 = vmatpush1.bf16.msra.mxu0 %v1968_v33  ;;  %2001 = vmatpush1.bf16.msra.mxu1 %v2000_v34  ;;  %v2889_v22 = vpack.c.bf16 %v484_v20, %v480_v19  ;;  %v2891_v23 = vpack.c.bf16 %v487_v21, %v483_v16  ;;  %v486_v25 = vld [vmem:[#allocation5 + $0xb0] sm:$0xff]  ;;  %v489_v27 = vld [vmem:[#allocation5 + $0xc8] sm:$0xff]  ;;  %v491_v29 = vld [vmem:[#allocation5 + $0xd8] sm:$0xff] }
  0x57   :  { %1971 = vmatprep.subr.bf16.mxu0 %v1970_v36  ;;  %2003 = vmatprep.subr.bf16.mxu1 %v2002_v37  ;;  %v2895_v26 = vpack.c.bf16 %v486_v25, %v482_v24  ;;  %v493_v28 = vld [vmem:[#allocation5 + $0xe8] sm:$0xff]  ;;  %v488_v31 = vld [vmem:[#allocation5 + $0xc0] sm:$0xff]  ;;  %v495_v33 = vld [vmem:[#allocation5 + $0xf8] sm:$0xff] }
  0x58   :  { %v2900_v30 = vpack.c.bf16 %v493_v28, %v489_v27  ;;  %v492_v32 = vld [vmem:[#allocation5 + $0xe0] sm:$0xff]  ;;  %v2906_v35 = vpack.c.bf16 %v495_v33, %v491_v29  ;;  %v490_v36 = vld [vmem:[#allocation5 + $0xd0] sm:$0xff]  ;;  %v497_v39 = vld [vmem:[#allocation5 + $0x108] sm:$0xff] }
  0x59   :  { %v2904_v34 = vpack.c.bf16 %v492_v32, %v488_v31  ;;  %v494_v37 = vld [vmem:[#allocation5 + $0xf0] sm:$0xff]  ;;  %v501_v40 = vld [vmem:[#allocation5 + $0x128] sm:$0xff]  ;;  %v496_v43 = vld [vmem:[#allocation5 + $0x100] sm:$0xff] }
  0x5a   :  { %1973 = vmatpush1.bf16.msra.mxu0 %v1972_v41  ;;  %2005 = vmatpush1.bf16.msra.mxu1 %v2004_v42  ;;  %v2910_v38 = vpack.c.bf16 %v494_v37, %v490_v36  ;;  %v499_v41 = vld [vmem:[#allocation5 + $0x118] sm:$0xff]  ;;  %v2914_v42 = vpack.c.bf16 %v501_v40, %v497_v39  ;;  %v504_v55 = vld [vmem:[#allocation5 + $0x140] sm:$0xff]  ;;  %v506_v63 = vld [vmem:[#allocation5 + $0x150] sm:$0xff] }
  0x5b   :  { %2007 = vmatprep.subr.bf16.mxu0 %v2862_v56  ;;  %2039 = vmatprep.subr.bf16.mxu1 %v2866_v61  ;;  %v507_v53 = vld [vmem:[#allocation5 + $0x158] sm:$0xff]  ;;  %v508_v57 = vld [vmem:[#allocation5 + $0x160] sm:$0xff]  ;;  %v510_v1 = vld [vmem:[#allocation5 + $0x170] sm:$0xff] }
  0x5c   :  { %v511_v58 = vld [vmem:[#allocation5 + $0x178] sm:$0xff]  ;;  %v2929_v59 = vpack.c.bf16 %v508_v57, %v504_v55  ;;  %v513_v2 = vld [vmem:[#allocation5 + $0x188] sm:$0xff]  ;;  %v2934_v3 = vpack.c.bf16 %v510_v1, %v506_v63  ;;  %v512_v6 = vld [vmem:[#allocation5 + $0x180] sm:$0xff] }
  0x5d   :  { %v2931_v62 = vpack.c.bf16 %v511_v58, %v507_v53  ;;  %v517_v5 = vld [vmem:[#allocation5 + $0x1a8] sm:$0xff]  ;;  %v516_v8 = vld [vmem:[#allocation5 + $0x1a0] sm:$0xff]  ;;  %v515_v14 = vld [vmem:[#allocation5 + $0x198] sm:$0xff] }
  0x5e   :  { %v2938_v11 = vpack.c.bf16 %v517_v5, %v513_v2  ;;  %v2940_v12 = vpack.c.bf16 %v516_v8, %v512_v6  ;;  %v519_v15 = vld [vmem:[#allocation5 + $0x1b8] sm:$0xff]  ;;  %v514_v16 = vld [vmem:[#allocation5 + $0x190] sm:$0xff]  ;;  %v521_v20 = vld [vmem:[#allocation5 + $0x1c8] sm:$0xff] }
  0x5f   :  { %v518_v19 = vld [vmem:[#allocation5 + $0x1b0] sm:$0xff]  ;;  %v525_v21 = vld [vmem:[#allocation5 + $0x1e8] sm:$0xff]  ;;  %v520_v27 = vld [vmem:[#allocation5 + $0x1c0] sm:$0xff] }
  0x60   :  { %v2946_v24 = vpack.c.bf16 %v518_v19, %v514_v16  ;;  %v2948_v25 = vpack.c.bf16 %v525_v21, %v521_v20  ;;  %v524_v28 = vld [vmem:[#allocation5 + $0x1e0] sm:$0xff]  ;;  %v523_v29 = vld [vmem:[#allocation5 + $0x1d8] sm:$0xff]  ;;  %v522_v32 = vld [vmem:[#allocation5 + $0x1d0] sm:$0xff] }
  0x61   :  { %v527_v31 = vld [vmem:[#allocation5 + $0x1f8] sm:$0xff]  ;;  %v526_v33 = vld [vmem:[#allocation5 + $0x1f0] sm:$0xff]  ;;  %v2952_v36 = vpack.c.bf16 %v524_v28, %v520_v27 }
  0x62   :  { %v2954_v37 = vpack.c.bf16 %v527_v31, %v523_v29  ;;  %v2958_v39 = vpack.c.bf16 %v526_v33, %v522_v32 }
  0xb7   :  { %v73_v45 = vpop.permute.xlu0 %72  ;;  %v79_v47 = vpop.permute.xlu1 %78 }
  0xb8   :  { %vm95_vm0 = vcmp.eq.s32.totalorder %v73_v45, %v2825_v44  ;;  %vm97_vm2 = vcmp.eq.s32.totalorder %v79_v47, %v2825_v44  ;;  %v503_v45 = vld [vmem:[#allocation5 + $0x138] sm:$0xff] }
  0xb9   :  { %1850 = vmatmul.mubr.msk.f32.vlgmr.msra.gmra.mrb[0].mxu0 %vm95_vm0, %v2723_v46  ;;  %1858 = vmatmul.mubr.msk.f32.vlgmr.msra.gmra.mrb[0].mxu1 %vm95_vm0, %v2723_v46  ;;  %v2919_v47 = vpack.c.bf16 %v503_v45, %v499_v41 }
  0xba   :  { %253 = vmatprep.mubr.f32.mxu0 %v2722_v7  ;;  %366 = vmatprep.mubr.f32.mxu1 %v2722_v7 }
  0xbb   :  { %v76_v48 = vpop.permute.xlu0 %75  ;;  %v82_v49 = vpop.permute.xlu1 %81  ;;  %2009 = vmatpush1.bf16.msra.mxu0 %v2864_v60  ;;  %2041 = vmatpush1.bf16.msra.mxu1 %v2869_v0 }
  0xbc   :  { %vm96_vm1 = vcmp.eq.s32.totalorder %v76_v48, %v2825_v44  ;;  %vm98_vm3 = vcmp.eq.s32.totalorder %v82_v49, %v2825_v44  ;;  %2011 = vmatprep.subr.bf16.mxu0 %v2874_v4  ;;  %2043 = vmatprep.subr.bf16.mxu1 %v2878_v10  ;;  %v498_v48 = vld [vmem:[#allocation5 + $0x110] sm:$0xff] }
  0xbd   :  { %1851 = vmatmul.mubr.msk.f32.gmra.mrb[2].mxu0 %vm96_vm1, %v2723_v46  ;;  %1859 = vmatmul.mubr.msk.f32.gmra.mrb[2].mxu1 %vm96_vm1, %v2723_v46  ;;  %v502_v49 = vld [vmem:[#allocation5 + $0x130] sm:$0xff] }
  0xbe   :  { %259 = vmatprep.mubr.f32.mxu0 %v2722_v7  ;;  %372 = vmatprep.mubr.f32.mxu1 %v2722_v7 }
  0xbf   :  { %v85_v50 = vpop.permute.xlu0 %84  ;;  %v88_v51 = vpop.permute.xlu1 %87  ;;  %2013 = vmatpush1.bf16.msra.mxu0 %v2876_v9  ;;  %2045 = vmatpush1.bf16.msra.mxu1 %v2881_v13 }
  0xc0   :  { %vm99_vm4 = vcmp.eq.s32.totalorder %v85_v50, %v2825_v44  ;;  %vm100_vm5 = vcmp.eq.s32.totalorder %v88_v51, %v2825_v44  ;;  %2015 = vmatprep.subr.bf16.mxu0 %v2886_v18  ;;  %2047 = vmatprep.subr.bf16.mxu1 %v2891_v23  ;;  %v2922_v50 = vpack.c.bf16 %v502_v49, %v498_v48  ;;  %v505_v51 = vld [vmem:[#allocation5 + $0x148] sm:$0xff] }
  0xc1   :  { %1852 = vmatmul.mubr.msk.f32.gmra.mrb[4].mxu0 %vm97_vm2, %v2723_v46  ;;  %1860 = vmatmul.mubr.msk.f32.gmra.mrb[4].mxu1 %vm97_vm2, %v2723_v46 }
  0xc2   :  { %265 = vmatprep.mubr.f32.mxu0 %v2722_v7  ;;  %378 = vmatprep.mubr.f32.mxu1 %v2722_v7 }
  0xc3   :  { %v91_v52 = vpop.permute.xlu0 %90  ;;  %2017 = vmatpush1.bf16.msra.mxu0 %v2889_v22  ;;  %2049 = vmatpush1.bf16.msra.mxu1 %v2895_v26 }
  0xc4   :  { %vm101_vm6 = vcmp.eq.s32.totalorder %v91_v52, %v2825_v44  ;;  %2019 = vmatprep.subr.bf16.mxu0 %v2900_v30  ;;  %2051 = vmatprep.subr.bf16.mxu1 %v2906_v35  ;;  %v509_v52 = vld [vmem:[#allocation5 + $0x168] sm:$0xff] }
  0xc5   :  { %1853 = vmatmul.mubr.msk.f32.gmra.mrb[6].mxu0 %vm98_vm3, %v2723_v46  ;;  %1861 = vmatmul.mubr.msk.f32.gmra.mrb[6].mxu1 %vm98_vm3, %v2723_v46  ;;  %v2926_v54 = vpack.c.bf16 %v509_v52, %v505_v51 }
  0xc6   :  { %271 = vmatprep.mubr.f32.mxu0 %v2722_v7  ;;  %384 = vmatprep.mubr.f32.mxu1 %v2722_v7 }
  0xc7   :  { %2021 = vmatpush1.bf16.msra.mxu0 %v2904_v34  ;;  %2053 = vmatpush1.bf16.msra.mxu1 %v2910_v38 }
  0xc8   :  { %2023 = vmatprep.subr.bf16.mxu0 %v2914_v42  ;;  %2055 = vmatprep.subr.bf16.mxu1 %v2919_v47 }
  0xc9   :  { %1854 = vmatmul.mubr.msk.f32.gmra.mrb[8].mxu0 %vm99_vm4, %v2723_v46  ;;  %1862 = vmatmul.mubr.msk.f32.gmra.mrb[8].mxu1 %vm99_vm4, %v2723_v46 }
  0xca   :  { %277 = vmatprep.mubr.f32.mxu0 %v2722_v7  ;;  %390 = vmatprep.mubr.f32.mxu1 %v2722_v7 }
  0xcb   :  { %2057 = vmatpush1.bf16.msra.mxu1 %v2922_v50 }
  0xcc   :  { %2059 = vmatprep.subr.bf16.mxu1 %v2931_v62 }
  0xcd   :  { %1855 = vmatmul.mubr.msk.f32.gmra.mrb[10].mxu0 %vm100_vm5, %v2723_v46  ;;  %1863 = vmatmul.mubr.msk.f32.gmra.mrb[10].mxu1 %vm100_vm5, %v2723_v46 }
  0xce   :  { %283 = vmatprep.mubr.f32.mxu0 %v2722_v7  ;;  %396 = vmatprep.mubr.f32.mxu1 %v2722_v7 }
  0xcf   :  { %v94_v17 = vpop.permute.xlu1 %93  ;;  %2061 = vmatpush1.bf16.msra.mxu1 %v2934_v3 }
  0xd0   :  { %vm102_vm7 = vcmp.eq.s32.totalorder %v94_v17, %v2825_v44  ;;  %v500_v44 = vld [vmem:[#allocation5 + $0x120] sm:$0xff]  ;;  %v2942_v17 = vpack.c.bf16 %v519_v15, %v515_v14 }
  0xd1   :  { %1856 = vmatmul.mubr.msk.f32.gmra.mrb[12].mxu0 %vm101_vm6, %v2723_v46  ;;  %1864 = vmatmul.mubr.msk.f32.gmra.mrb[12].mxu1 %vm101_vm6, %v2723_v46 }
  0xd2   :  { %289 = vmatprep.mubr.f32.mxu0 %v2722_v7  ;;  %402 = vmatprep.mubr.f32.mxu1 %v2722_v7 }
  0xd3   :  { %2063 = vmatprep.subr.bf16.mxu1 %v2942_v17 }
  0xd4   :  { %2065 = vmatpush1.bf16.msra.mxu1 %v2946_v24 }
  0xd5   :  { %1857 = vmatmul.mubr.msk.f32.gmra.mrb[14].mxu0 %vm102_vm7, %v2723_v46  ;;  %1865 = vmatmul.mubr.msk.f32.gmra.mrb[14].mxu1 %vm102_vm7, %v2723_v46  ;;  %v2917_v46 = vpack.c.bf16 %v500_v44, %v496_v43 }
  0xd6   :  { %592 = vmatprep.mubr.f32.mxu0 %v2722_v7  ;;  %663 = vmatprep.mubr.f32.mxu1 %v2722_v7 }
  0xd7   :  { %2025 = vmatpush1.bf16.msra.mxu0 %v2917_v46  ;;  %2067 = vmatprep.subr.bf16.mxu1 %v2954_v37 }
  0xd8   :  { %2027 = vmatprep.subr.bf16.mxu0 %v2926_v54  ;;  %2069 = vmatpush1.bf16.msra.mxu1 %v2958_v39 }
  0xd9   :  { %2103 = vmatprep.subr.bf16.mxu1 %v2866_v61 }
  0xdb   :  { %2029 = vmatpush1.bf16.msra.mxu0 %v2929_v59 }
  0xdc   :  { %2031 = vmatprep.subr.bf16.mxu0 %v2938_v11 }
  0xdf   :  { %2033 = vmatpush1.bf16.msra.mxu0 %v2940_v12 }
  0xe0   :  { %2035 = vmatprep.subr.bf16.mxu0 %v2948_v25 }
  0xe3   :  { %2037 = vmatpush1.bf16.msra.mxu0 %v2952_v36 }
  0xe4   :  { %2071 = vmatprep.subr.bf16.mxu0 %v2862_v56 }
 0x18c   :  { %v249_v40 = vpop.f32.mrb[0].mxu0  ;;  %v362_v41 = vpop.f32.mrb[0].mxu1 }
 0x18d   :  { %v1866_v43 = vmul.f32 -1.442695, %v249_v40  ;;  %v251_v44 = vpop.f32.mrb[1].mxu0  ;;  %v364_v45 = vpop.f32.mrb[1].mxu1  ;;  %v1867_v48 = vmul.f32 -1.442695, %v362_v41 }
 0x18f   :  { %2520 = vpow2.f32 %v1866_v43 }
 0x190   :  { %2522 = vpow2.f32 %v1867_v48 }
 0x191   :  { %2524 = vtanh.f32 %v364_v45 }
 0x199   :  { %v2521_v49 = vpop.eup %2520 }
 0x19a   :  { %v450_v51 = vadd.f32 1.0, %v2521_v49  ;;  %v2523_v52 = vpop.eup %2522 }
 0x19b   :  { %v451_v53 = vadd.f32 1.0, %v2523_v52  ;;  %v2525_v55 = vpop.eup %2524 }
 0x19c   :  { %2526 = vrcp.f32 %v450_v51 }
 0x19d   :  { %2528 = vrcp.f32 %v451_v53 }
 0x1a6   :  { %v2527_v57 = vpop.eup %2526 }
 0x1a7   :  { %v2965_v58 = vmul.f32 %v2527_v57, %v2525_v55  ;;  %v2529_v63 = vpop.eup %2528 }
 0x1a9   :  { %2530 = vtanh.f32 %v2965_v58 }
 0x1b3   :  { %v2531_v1 = vpop.eup %2530 }
 0x1b4   :  { %v459_v2 = vmul.f32 %v2531_v1, %v2529_v63 }
 0x1b6   :  { %593 = vmatmul.mubr.f32.vlgmr.msra.gmra.mrb[2].mxu0 %v459_v2  ;;  %664 = vmatmul.mubr.f32.vlgmr.msra.gmra.mrb[2].mxu1 %v459_v2 }
 0x1b7   :  { %2073 = vmatpush1.bf16.msra.mxu0 %v2864_v60  ;;  %2105 = vmatpush1.bf16.msra.mxu1 %v2869_v0 }
 0x1b8   :  { %2075 = vmatprep.subr.bf16.mxu0 %v2874_v4  ;;  %2107 = vmatprep.subr.bf16.mxu1 %v2878_v10 }
 0x1b9   :  { %766 = vmatprep.mubr.f32.mxu0 %v2722_v7  ;;  %837 = vmatprep.mubr.f32.mxu1 %v2722_v7 }
 0x1bb   :  { %2077 = vmatpush1.bf16.msra.mxu0 %v2876_v9  ;;  %2109 = vmatpush1.bf16.msra.mxu1 %v2881_v13 }
 0x1bc   :  { %2079 = vmatprep.subr.bf16.mxu0 %v2886_v18  ;;  %2111 = vmatprep.subr.bf16.mxu1 %v2891_v23 }
 0x1bf   :  { %2081 = vmatpush1.bf16.msra.mxu0 %v2889_v22  ;;  %2113 = vmatpush1.bf16.msra.mxu1 %v2895_v26 }
 0x1c0   :  { %2083 = vmatprep.subr.bf16.mxu0 %v2900_v30  ;;  %2115 = vmatprep.subr.bf16.mxu1 %v2906_v35 }
 0x1c3   :  { %2085 = vmatpush1.bf16.msra.mxu0 %v2904_v34  ;;  %2117 = vmatpush1.bf16.msra.mxu1 %v2910_v38 }
 0x1c4   :  { %2087 = vmatprep.subr.bf16.mxu0 %v2914_v42  ;;  %2119 = vmatprep.subr.bf16.mxu1 %v2919_v47 }
 0x1c7   :  { %2089 = vmatpush1.bf16.msra.mxu0 %v2917_v46  ;;  %2121 = vmatpush1.bf16.msra.mxu1 %v2922_v50 }
 0x1c8   :  { %2091 = vmatprep.subr.bf16.mxu0 %v2926_v54  ;;  %2123 = vmatprep.subr.bf16.mxu1 %v2931_v62 }
 0x1cb   :  { %2093 = vmatpush1.bf16.msra.mxu0 %v2929_v59  ;;  %2125 = vmatpush1.bf16.msra.mxu1 %v2934_v3 }
 0x1cc   :  { %2095 = vmatprep.subr.bf16.mxu0 %v2938_v11  ;;  %2127 = vmatprep.subr.bf16.mxu1 %v2942_v17 }
 0x1cf   :  { %2097 = vmatpush1.bf16.msra.mxu0 %v2940_v12  ;;  %2129 = vmatpush1.bf16.msra.mxu1 %v2946_v24 }
 0x1d0   :  { %2099 = vmatprep.subr.bf16.mxu0 %v2948_v25  ;;  %2131 = vmatprep.subr.bf16.mxu1 %v2954_v37 }
 0x1d3   :  { %2101 = vmatpush1.bf16.msra.mxu0 %v2952_v36  ;;  %2133 = vmatpush1.bf16.msra.mxu1 %v2958_v39 }
 0x1d4   :  { %2135 = vmatprep.subr.bf16.mxu0 %v2862_v56  ;;  %2167 = vmatprep.subr.bf16.mxu1 %v2866_v61 }
 0x289   :  { %v594_v5 = vpop.f32.mrb[2].mxu0  ;;  %v665_v6 = vpop.f32.mrb[2].mxu1 }
 0x28a   :  { %v1868_v8 = vmul.f32 -1.442695, %v594_v5  ;;  %v596_v14 = vpop.f32.mrb[3].mxu0  ;;  %v667_v15 = vpop.f32.mrb[3].mxu1  ;;  %v1870_v19 = vmul.f32 -1.442695, %v665_v6 }
 0x28b   :  { %v1869_v16 = vmul.f32 -1.442695, %v596_v14 }
 0x28c   :  { %2532 = vpow2.f32 %v1868_v8 }
 0x28d   :  { %2534 = vpow2.f32 %v1869_v16 }
 0x28e   :  { %2536 = vtanh.f32 %v667_v15 }
 0x28f   :  { %2538 = vpow2.f32 %v1870_v19 }
 0x296   :  { %v2533_v20 = vpop.eup %2532 }
 0x297   :  { %v683_v21 = vadd.f32 1.0, %v2533_v20  ;;  %v2535_v27 = vpop.eup %2534 }
 0x298   :  { %v684_v28 = vadd.f32 1.0, %v2535_v27  ;;  %v2537_v29 = vpop.eup %2536 }
 0x299   :  { %2540 = vrcp.f32 %v683_v21  ;;  %v2539_v31 = vpop.eup %2538 }
 0x29a   :  { %2542 = vrcp.f32 %v684_v28  ;;  %v685_v41 = vadd.f32 1.0, %v2539_v31 }
 0x29c   :  { %2544 = vrcp.f32 %v685_v41 }
 0x2a3   :  { %v2541_v32 = vpop.eup %2540 }
 0x2a4   :  { %v694_v33 = vmul.f32 %v2541_v32, %v2537_v29  ;;  %v2543_v40 = vpop.eup %2542 }
 0x2a5   :  { %v693_v43 = vmul.f32 %v2543_v40, %v2965_v58 }
 0x2a6   :  { %v2545_v45 = vpop.eup %2544 }
 0x2a7   :  { %v3003_v44 = vadd.f32 %v694_v33, %v693_v43 }
 0x2a9   :  { %2546 = vtanh.f32 %v3003_v44 }
 0x2b3   :  { %v2547_v48 = vpop.eup %2546 }
 0x2b4   :  { %v697_v49 = vmul.f32 %v2547_v48, %v2545_v45 }
 0x2b6   :  { %767 = vmatmul.mubr.f32.vlgmr.msra.gmra.mrb[4].mxu0 %v697_v49  ;;  %838 = vmatmul.mubr.f32.vlgmr.msra.gmra.mrb[4].mxu1 %v697_v49 }
 0x2b7   :  { %2137 = vmatpush1.bf16.msra.mxu0 %v2864_v60  ;;  %2169 = vmatpush1.bf16.msra.mxu1 %v2869_v0 }
 0x2b8   :  { %2139 = vmatprep.subr.bf16.mxu0 %v2874_v4  ;;  %2171 = vmatprep.subr.bf16.mxu1 %v2878_v10 }
 0x2b9   :  { %940 = vmatprep.mubr.f32.mxu0 %v2722_v7  ;;  %1011 = vmatprep.mubr.f32.mxu1 %v2722_v7 }
 0x2bb   :  { %2141 = vmatpush1.bf16.msra.mxu0 %v2876_v9  ;;  %2173 = vmatpush1.bf16.msra.mxu1 %v2881_v13 }
 0x2bc   :  { %2143 = vmatprep.subr.bf16.mxu0 %v2886_v18  ;;  %2175 = vmatprep.subr.bf16.mxu1 %v2891_v23 }
 0x2bf   :  { %2145 = vmatpush1.bf16.msra.mxu0 %v2889_v22  ;;  %2177 = vmatpush1.bf16.msra.mxu1 %v2895_v26 }
 0x2c0   :  { %2147 = vmatprep.subr.bf16.mxu0 %v2900_v30  ;;  %2179 = vmatprep.subr.bf16.mxu1 %v2906_v35 }
 0x2c3   :  { %2149 = vmatpush1.bf16.msra.mxu0 %v2904_v34  ;;  %2181 = vmatpush1.bf16.msra.mxu1 %v2910_v38 }
 0x2c4   :  { %2151 = vmatprep.subr.bf16.mxu0 %v2914_v42  ;;  %2183 = vmatprep.subr.bf16.mxu1 %v2919_v47 }
 0x2c7   :  { %2153 = vmatpush1.bf16.msra.mxu0 %v2917_v46  ;;  %2185 = vmatpush1.bf16.msra.mxu1 %v2922_v50 }
 0x2c8   :  { %2155 = vmatprep.subr.bf16.mxu0 %v2926_v54  ;;  %2187 = vmatprep.subr.bf16.mxu1 %v2931_v62 }
 0x2cb   :  { %2157 = vmatpush1.bf16.msra.mxu0 %v2929_v59  ;;  %2189 = vmatpush1.bf16.msra.mxu1 %v2934_v3 }
 0x2cc   :  { %2159 = vmatprep.subr.bf16.mxu0 %v2938_v11  ;;  %2191 = vmatprep.subr.bf16.mxu1 %v2942_v17 }
 0x2cf   :  { %2161 = vmatpush1.bf16.msra.mxu0 %v2940_v12  ;;  %2193 = vmatpush1.bf16.msra.mxu1 %v2946_v24 }
 0x2d0   :  { %2163 = vmatprep.subr.bf16.mxu0 %v2948_v25  ;;  %2195 = vmatprep.subr.bf16.mxu1 %v2954_v37 }
 0x2d3   :  { %2165 = vmatpush1.bf16.msra.mxu0 %v2952_v36  ;;  %2197 = vmatpush1.bf16.msra.mxu1 %v2958_v39 }
 0x2d4   :  { %2199 = vmatprep.subr.bf16.mxu0 %v2862_v56  ;;  %2231 = vmatprep.subr.bf16.mxu1 %v2866_v61 }
 0x389   :  { %v768_v51 = vpop.f32.mrb[4].mxu0  ;;  %v839_v52 = vpop.f32.mrb[4].mxu1 }
 0x38a   :  { %v1871_v53 = vmul.f32 -1.442695, %v768_v51  ;;  %v770_v55 = vpop.f32.mrb[5].mxu0  ;;  %v841_v57 = vpop.f32.mrb[5].mxu1  ;;  %v1873_v63 = vmul.f32 -1.442695, %v839_v52 }
 0x38b   :  { %v1872_v58 = vmul.f32 -1.442695, %v770_v55 }
 0x38c   :  { %2548 = vpow2.f32 %v1871_v53 }
 0x38d   :  { %2550 = vpow2.f32 %v1872_v58 }
 0x38e   :  { %2552 = vtanh.f32 %v841_v57 }
 0x38f   :  { %2554 = vpow2.f32 %v1873_v63 }
 0x396   :  { %v2549_v1 = vpop.eup %2548 }
 0x397   :  { %v857_v2 = vadd.f32 1.0, %v2549_v1  ;;  %v2551_v5 = vpop.eup %2550 }
 0x398   :  { %v858_v6 = vadd.f32 1.0, %v2551_v5  ;;  %v2553_v8 = vpop.eup %2552 }
 0x399   :  { %2556 = vrcp.f32 %v857_v2  ;;  %v2555_v14 = vpop.eup %2554 }
 0x39a   :  { %2558 = vrcp.f32 %v858_v6  ;;  %v859_v20 = vadd.f32 1.0, %v2555_v14 }
 0x39c   :  { %2560 = vrcp.f32 %v859_v20 }
 0x3a3   :  { %v2557_v15 = vpop.eup %2556 }
 0x3a4   :  { %v868_v16 = vmul.f32 %v2557_v15, %v2553_v8  ;;  %v2559_v19 = vpop.eup %2558 }
 0x3a5   :  { %v867_v21 = vmul.f32 %v2559_v19, %v3003_v44 }
 0x3a6   :  { %v2561_v28 = vpop.eup %2560 }
 0x3a7   :  { %v3041_v27 = vadd.f32 %v868_v16, %v867_v21 }
 0x3a9   :  { %2562 = vtanh.f32 %v3041_v27 }
 0x3b3   :  { %v2563_v29 = vpop.eup %2562 }
 0x3b4   :  { %v871_v31 = vmul.f32 %v2563_v29, %v2561_v28 }
 0x3b6   :  { %941 = vmatmul.mubr.f32.vlgmr.msra.gmra.mrb[6].mxu0 %v871_v31  ;;  %1012 = vmatmul.mubr.f32.vlgmr.msra.gmra.mrb[6].mxu1 %v871_v31 }
 0x3b7   :  { %2201 = vmatpush1.bf16.msra.mxu0 %v2864_v60  ;;  %2233 = vmatpush1.bf16.msra.mxu1 %v2869_v0 }
 0x3b8   :  { %2203 = vmatprep.subr.bf16.mxu0 %v2874_v4  ;;  %2235 = vmatprep.subr.bf16.mxu1 %v2878_v10 }
 0x3b9   :  { %1114 = vmatprep.mubr.f32.mxu0 %v2722_v7  ;;  %1185 = vmatprep.mubr.f32.mxu1 %v2722_v7 }
 0x3bb   :  { %2205 = vmatpush1.bf16.msra.mxu0 %v2876_v9  ;;  %2237 = vmatpush1.bf16.msra.mxu1 %v2881_v13 }
 0x3bc   :  { %2207 = vmatprep.subr.bf16.mxu0 %v2886_v18  ;;  %2239 = vmatprep.subr.bf16.mxu1 %v2891_v23 }
 0x3bf   :  { %2209 = vmatpush1.bf16.msra.mxu0 %v2889_v22  ;;  %2241 = vmatpush1.bf16.msra.mxu1 %v2895_v26 }
 0x3c0   :  { %2211 = vmatprep.subr.bf16.mxu0 %v2900_v30  ;;  %2243 = vmatprep.subr.bf16.mxu1 %v2906_v35 }
 0x3c3   :  { %2213 = vmatpush1.bf16.msra.mxu0 %v2904_v34  ;;  %2245 = vmatpush1.bf16.msra.mxu1 %v2910_v38 }
 0x3c4   :  { %2215 = vmatprep.subr.bf16.mxu0 %v2914_v42  ;;  %2247 = vmatprep.subr.bf16.mxu1 %v2919_v47 }
 0x3c7   :  { %2217 = vmatpush1.bf16.msra.mxu0 %v2917_v46  ;;  %2249 = vmatpush1.bf16.msra.mxu1 %v2922_v50 }
 0x3c8   :  { %2219 = vmatprep.subr.bf16.mxu0 %v2926_v54  ;;  %2251 = vmatprep.subr.bf16.mxu1 %v2931_v62 }
 0x3cb   :  { %2221 = vmatpush1.bf16.msra.mxu0 %v2929_v59  ;;  %2253 = vmatpush1.bf16.msra.mxu1 %v2934_v3 }
 0x3cc   :  { %2223 = vmatprep.subr.bf16.mxu0 %v2938_v11  ;;  %2255 = vmatprep.subr.bf16.mxu1 %v2942_v17 }
 0x3cf   :  { %2225 = vmatpush1.bf16.msra.mxu0 %v2940_v12  ;;  %2257 = vmatpush1.bf16.msra.mxu1 %v2946_v24 }
 0x3d0   :  { %2227 = vmatprep.subr.bf16.mxu0 %v2948_v25  ;;  %2259 = vmatprep.subr.bf16.mxu1 %v2954_v37 }
 0x3d3   :  { %2229 = vmatpush1.bf16.msra.mxu0 %v2952_v36  ;;  %2261 = vmatpush1.bf16.msra.mxu1 %v2958_v39 }
 0x3d4   :  { %2263 = vmatprep.subr.bf16.mxu0 %v2862_v56  ;;  %2295 = vmatprep.subr.bf16.mxu1 %v2866_v61 }
 0x489   :  { %v942_v32 = vpop.f32.mrb[6].mxu0  ;;  %v1013_v33 = vpop.f32.mrb[6].mxu1 }
 0x48a   :  { %v1874_v40 = vmul.f32 -1.442695, %v942_v32  ;;  %v944_v41 = vpop.f32.mrb[7].mxu0  ;;  %v1015_v43 = vpop.f32.mrb[7].mxu1  ;;  %v1876_v45 = vmul.f32 -1.442695, %v1013_v33 }
 0x48b   :  { %v1875_v44 = vmul.f32 -1.442695, %v944_v41 }
 0x48c   :  { %2564 = vpow2.f32 %v1874_v40 }
 0x48d   :  { %2566 = vpow2.f32 %v1875_v44 }
 0x48e   :  { %2568 = vtanh.f32 %v1015_v43 }
 0x48f   :  { %2570 = vpow2.f32 %v1876_v45 }
 0x496   :  { %v2565_v48 = vpop.eup %2564 }
 0x497   :  { %v1031_v49 = vadd.f32 1.0, %v2565_v48  ;;  %v2567_v51 = vpop.eup %2566 }
 0x498   :  { %v1032_v52 = vadd.f32 1.0, %v2567_v51  ;;  %v2569_v53 = vpop.eup %2568 }
 0x499   :  { %2572 = vrcp.f32 %v1031_v49  ;;  %v2571_v55 = vpop.eup %2570 }
 0x49a   :  { %2574 = vrcp.f32 %v1032_v52  ;;  %v1033_v1 = vadd.f32 1.0, %v2571_v55 }
 0x49c   :  { %2576 = vrcp.f32 %v1033_v1 }
 0x4a3   :  { %v2573_v57 = vpop.eup %2572 }
 0x4a4   :  { %v1042_v58 = vmul.f32 %v2573_v57, %v2569_v53  ;;  %v2575_v63 = vpop.eup %2574 }
 0x4a5   :  { %v1041_v2 = vmul.f32 %v2575_v63, %v3041_v27 }
 0x4a6   :  { %v2577_v6 = vpop.eup %2576 }
 0x4a7   :  { %v3079_v5 = vadd.f32 %v1042_v58, %v1041_v2 }
 0x4a9   :  { %2578 = vtanh.f32 %v3079_v5 }
 0x4b3   :  { %v2579_v8 = vpop.eup %2578 }
 0x4b4   :  { %v1045_v14 = vmul.f32 %v2579_v8, %v2577_v6 }
 0x4b6   :  { %1115 = vmatmul.mubr.f32.vlgmr.msra.gmra.mrb[8].mxu0 %v1045_v14  ;;  %1186 = vmatmul.mubr.f32.vlgmr.msra.gmra.mrb[8].mxu1 %v1045_v14 }
 0x4b7   :  { %2265 = vmatpush1.bf16.msra.mxu0 %v2864_v60  ;;  %2297 = vmatpush1.bf16.msra.mxu1 %v2869_v0 }
 0x4b8   :  { %2267 = vmatprep.subr.bf16.mxu0 %v2874_v4  ;;  %2299 = vmatprep.subr.bf16.mxu1 %v2878_v10 }
 0x4b9   :  { %1288 = vmatprep.mubr.f32.mxu0 %v2722_v7  ;;  %1359 = vmatprep.mubr.f32.mxu1 %v2722_v7 }
 0x4bb   :  { %2269 = vmatpush1.bf16.msra.mxu0 %v2876_v9  ;;  %2301 = vmatpush1.bf16.msra.mxu1 %v2881_v13 }
 0x4bc   :  { %2271 = vmatprep.subr.bf16.mxu0 %v2886_v18  ;;  %2303 = vmatprep.subr.bf16.mxu1 %v2891_v23 }
 0x4bf   :  { %2273 = vmatpush1.bf16.msra.mxu0 %v2889_v22  ;;  %2305 = vmatpush1.bf16.msra.mxu1 %v2895_v26 }
 0x4c0   :  { %2275 = vmatprep.subr.bf16.mxu0 %v2900_v30  ;;  %2307 = vmatprep.subr.bf16.mxu1 %v2906_v35 }
 0x4c3   :  { %2277 = vmatpush1.bf16.msra.mxu0 %v2904_v34  ;;  %2309 = vmatpush1.bf16.msra.mxu1 %v2910_v38 }
 0x4c4   :  { %2279 = vmatprep.subr.bf16.mxu0 %v2914_v42  ;;  %2311 = vmatprep.subr.bf16.mxu1 %v2919_v47 }
 0x4c7   :  { %2281 = vmatpush1.bf16.msra.mxu0 %v2917_v46  ;;  %2313 = vmatpush1.bf16.msra.mxu1 %v2922_v50 }
 0x4c8   :  { %2283 = vmatprep.subr.bf16.mxu0 %v2926_v54  ;;  %2315 = vmatprep.subr.bf16.mxu1 %v2931_v62 }
 0x4cb   :  { %2285 = vmatpush1.bf16.msra.mxu0 %v2929_v59  ;;  %2317 = vmatpush1.bf16.msra.mxu1 %v2934_v3 }
 0x4cc   :  { %2287 = vmatprep.subr.bf16.mxu0 %v2938_v11  ;;  %2319 = vmatprep.subr.bf16.mxu1 %v2942_v17 }
 0x4cf   :  { %2289 = vmatpush1.bf16.msra.mxu0 %v2940_v12  ;;  %2321 = vmatpush1.bf16.msra.mxu1 %v2946_v24 }
 0x4d0   :  { %2291 = vmatprep.subr.bf16.mxu0 %v2948_v25  ;;  %2323 = vmatprep.subr.bf16.mxu1 %v2954_v37 }
 0x4d3   :  { %2293 = vmatpush1.bf16.msra.mxu0 %v2952_v36  ;;  %2325 = vmatpush1.bf16.msra.mxu1 %v2958_v39 }
 0x4d4   :  { %2327 = vmatprep.subr.bf16.mxu0 %v2862_v56  ;;  %2359 = vmatprep.subr.bf16.mxu1 %v2866_v61 }
 0x589   :  { %v1116_v15 = vpop.f32.mrb[8].mxu0  ;;  %v1187_v16 = vpop.f32.mrb[8].mxu1 }
 0x58a   :  { %v1877_v19 = vmul.f32 -1.442695, %v1116_v15  ;;  %v1118_v20 = vpop.f32.mrb[9].mxu0  ;;  %v1189_v21 = vpop.f32.mrb[9].mxu1  ;;  %v1879_v28 = vmul.f32 -1.442695, %v1187_v16 }
 0x58b   :  { %v1878_v27 = vmul.f32 -1.442695, %v1118_v20 }
 0x58c   :  { %2580 = vpow2.f32 %v1877_v19 }
 0x58d   :  { %2582 = vpow2.f32 %v1878_v27 }
 0x58e   :  { %2584 = vtanh.f32 %v1189_v21 }
 0x58f   :  { %2586 = vpow2.f32 %v1879_v28 }
 0x596   :  { %v2581_v29 = vpop.eup %2580 }
 0x597   :  { %v1205_v31 = vadd.f32 1.0, %v2581_v29  ;;  %v2583_v32 = vpop.eup %2582 }
 0x598   :  { %v1206_v33 = vadd.f32 1.0, %v2583_v32  ;;  %v2585_v40 = vpop.eup %2584 }
 0x599   :  { %2588 = vrcp.f32 %v1205_v31  ;;  %v2587_v41 = vpop.eup %2586 }
 0x59a   :  { %2590 = vrcp.f32 %v1206_v33  ;;  %v1207_v48 = vadd.f32 1.0, %v2587_v41 }
 0x59c   :  { %2592 = vrcp.f32 %v1207_v48  ;;  %v1750_v48 = vld [vmem:[#allocation7 + $0x40] sm:$0xff] }
 0x5a3   :  { %v2589_v43 = vpop.eup %2588 }
 0x5a4   :  { %v1216_v44 = vmul.f32 %v2589_v43, %v2585_v40  ;;  %v2591_v45 = vpop.eup %2590  ;;  %v1747_v40 = vld [vmem:[#allocation7 + $0x28] sm:$0xff]  ;;  %v1748_v43 = vld [vmem:[#allocation7 + $0x30] sm:$0xff] }
 0x5a5   :  { %v1215_v49 = vmul.f32 %v2591_v45, %v3079_v5 }
 0x5a6   :  { %v2593_v52 = vpop.eup %2592 }
 0x5a7   :  { %v3117_v51 = vadd.f32 %v1216_v44, %v1215_v49  ;;  %v1749_v44 = vld [vmem:[#allocation7 + $0x38] sm:$0xff]  ;;  %v1751_v49 = vld [vmem:[#allocation7 + $0x48] sm:$0xff] }
 0x5a8   :  { %v2464_v45 = vpack.c.bf16 %v1749_v44, %v1748_v43 }
 0x5a9   :  { %2594 = vtanh.f32 %v3117_v51 }
 0x5b3   :  { %v2595_v53 = vpop.eup %2594 }
 0x5b4   :  { %v1219_v55 = vmul.f32 %v2595_v53, %v2593_v52  ;;  %v1752_v52 = vld [vmem:[#allocation7 + $0x50] sm:$0xff]  ;;  %v1753_v53 = vld [vmem:[#allocation7 + $0x58] sm:$0xff] }
 0x5b6   :  { %1289 = vmatmul.mubr.f32.vlgmr.msra.gmra.mrb[10].mxu0 %v1219_v55  ;;  %1360 = vmatmul.mubr.f32.vlgmr.msra.gmra.mrb[10].mxu1 %v1219_v55  ;;  %v2470_v55 = vpack.c.bf16 %v1753_v53, %v1752_v52 }
 0x5b7   :  { %2329 = vmatpush1.bf16.msra.mxu0 %v2864_v60  ;;  %2361 = vmatpush1.bf16.msra.mxu1 %v2869_v0 }
 0x5b8   :  { %2331 = vmatprep.subr.bf16.mxu0 %v2874_v4  ;;  %2363 = vmatprep.subr.bf16.mxu1 %v2878_v10 }
 0x5b9   :  { %1462 = vmatprep.mubr.f32.mxu0 %v2722_v7  ;;  %1533 = vmatprep.mubr.f32.mxu1 %v2722_v7 }
 0x5bb   :  { %2333 = vmatpush1.bf16.msra.mxu0 %v2876_v9  ;;  %2365 = vmatpush1.bf16.msra.mxu1 %v2881_v13 }
 0x5bc   :  { %2335 = vmatprep.subr.bf16.mxu0 %v2886_v18  ;;  %2367 = vmatprep.subr.bf16.mxu1 %v2891_v23 }
 0x5bf   :  { %2337 = vmatpush1.bf16.msra.mxu0 %v2889_v22  ;;  %2369 = vmatpush1.bf16.msra.mxu1 %v2895_v26 }
 0x5c0   :  { %2339 = vmatprep.subr.bf16.mxu0 %v2900_v30  ;;  %2371 = vmatprep.subr.bf16.mxu1 %v2906_v35 }
 0x5c3   :  { %2341 = vmatpush1.bf16.msra.mxu0 %v2904_v34  ;;  %2373 = vmatpush1.bf16.msra.mxu1 %v2910_v38 }
 0x5c4   :  { %2343 = vmatprep.subr.bf16.mxu0 %v2914_v42  ;;  %2375 = vmatprep.subr.bf16.mxu1 %v2919_v47 }
 0x5c7   :  { %2345 = vmatpush1.bf16.msra.mxu0 %v2917_v46  ;;  %2377 = vmatpush1.bf16.msra.mxu1 %v2922_v50 }
 0x5c8   :  { %2347 = vmatprep.subr.bf16.mxu0 %v2926_v54  ;;  %2379 = vmatprep.subr.bf16.mxu1 %v2931_v62 }
 0x5cb   :  { %2349 = vmatpush1.bf16.msra.mxu0 %v2929_v59  ;;  %2381 = vmatpush1.bf16.msra.mxu1 %v2934_v3 }
 0x5cc   :  { %2351 = vmatprep.subr.bf16.mxu0 %v2938_v11  ;;  %2383 = vmatprep.subr.bf16.mxu1 %v2942_v17 }
 0x5cf   :  { %2353 = vmatpush1.bf16.msra.mxu0 %v2940_v12  ;;  %2385 = vmatpush1.bf16.msra.mxu1 %v2946_v24 }
 0x5d0   :  { %2355 = vmatprep.subr.bf16.mxu0 %v2948_v25  ;;  %2387 = vmatprep.subr.bf16.mxu1 %v2954_v37 }
 0x5d3   :  { %2357 = vmatpush1.bf16.msra.mxu0 %v2952_v36  ;;  %2389 = vmatpush1.bf16.msra.mxu1 %v2958_v39 }
 0x5d4   :  { %2391 = vmatprep.subr.bf16.mxu0 %v2862_v56  ;;  %2423 = vmatprep.subr.bf16.mxu1 %v2866_v61 }
 0x689   :  { %v1290_v57 = vpop.f32.mrb[10].mxu0  ;;  %v1361_v58 = vpop.f32.mrb[10].mxu1 }
 0x68a   :  { %v1880_v63 = vmul.f32 -1.442695, %v1290_v57  ;;  %v1292_v1 = vpop.f32.mrb[11].mxu0  ;;  %v1363_v2 = vpop.f32.mrb[11].mxu1  ;;  %v1882_v6 = vmul.f32 -1.442695, %v1361_v58 }
 0x68b   :  { %v1881_v5 = vmul.f32 -1.442695, %v1292_v1  ;;  %v1754_v57 = vld [vmem:[#allocation7 + $0x60] sm:$0xff]  ;;  %v1755_v58 = vld [vmem:[#allocation7 + $0x68] sm:$0xff]  ;;  %v1756_v1 = vld [vmem:[#allocation7 + $0x70] sm:$0xff] }
 0x68c   :  { %2596 = vpow2.f32 %v1880_v63  ;;  %v2473_v63 = vpack.c.bf16 %v1755_v58, %v1754_v57 }
 0x68d   :  { %2598 = vpow2.f32 %v1881_v5 }
 0x68e   :  { %2600 = vtanh.f32 %v1363_v2  ;;  %v1757_v2 = vld [vmem:[#allocation7 + $0x78] sm:$0xff] }
 0x68f   :  { %2602 = vpow2.f32 %v1882_v6  ;;  %v2476_v5 = vpack.c.bf16 %v1757_v2, %v1756_v1 }
 0x696   :  { %v2597_v8 = vpop.eup %2596 }
 0x697   :  { %v1379_v14 = vadd.f32 1.0, %v2597_v8  ;;  %v2599_v15 = vpop.eup %2598 }
 0x698   :  { %v1380_v16 = vadd.f32 1.0, %v2599_v15  ;;  %v2601_v56 = vpop.eup %2600 }
 0x699   :  { %2604 = vrcp.f32 %v1379_v14  ;;  %v2603_v19 = vpop.eup %2602 }
 0x69a   :  { %2606 = vrcp.f32 %v1380_v16  ;;  %v1381_v27 = vadd.f32 1.0, %v2603_v19 }
 0x69c   :  { %2608 = vrcp.f32 %v1381_v27 }
 0x6a3   :  { %v2605_v61 = vpop.eup %2604 }
 0x6a4   :  { %v1390_v20 = vmul.f32 %v2605_v61, %v2601_v56  ;;  %v2607_v21 = vpop.eup %2606 }
 0x6a5   :  { %v1389_v28 = vmul.f32 %v2607_v21, %v3117_v51  ;;  %v2467_v51 = vpack.c.bf16 %v1751_v49, %v1750_v48 }
 0x6a6   :  { %v2609_v31 = vpop.eup %2608 }
 0x6a7   :  { %v3155_v29 = vadd.f32 %v1390_v20, %v1389_v28 }
 0x6a9   :  { %2610 = vtanh.f32 %v3155_v29 }
 0x6b3   :  { %v2611_v32 = vpop.eup %2610 }
 0x6b4   :  { %v1393_v33 = vmul.f32 %v2611_v32, %v2609_v31 }
 0x6b6   :  { %1463 = vmatmul.mubr.f32.vlgmr.msra.gmra.mrb[12].mxu0 %v1393_v33  ;;  %1534 = vmatmul.mubr.f32.vlgmr.msra.gmra.mrb[12].mxu1 %v1393_v33 }
 0x6b7   :  { %2393 = vmatpush1.bf16.msra.mxu0 %v2864_v60  ;;  %2425 = vmatpush1.bf16.msra.mxu1 %v2869_v0 }
 0x6b8   :  { %2395 = vmatprep.subr.bf16.mxu0 %v2874_v4  ;;  %2427 = vmatprep.subr.bf16.mxu1 %v2878_v10 }
 0x6b9   :  { %1636 = vmatprep.mubr.f32.mxu0 %v2722_v7  ;;  %1707 = vmatprep.mubr.f32.mxu1 %v2722_v7 }
 0x6bb   :  { %2397 = vmatpush1.bf16.msra.mxu0 %v2876_v9  ;;  %2429 = vmatpush1.bf16.msra.mxu1 %v2881_v13 }
 0x6bc   :  { %2399 = vmatprep.subr.bf16.mxu0 %v2886_v18  ;;  %2431 = vmatprep.subr.bf16.mxu1 %v2891_v23 }
 0x6bf   :  { %2401 = vmatpush1.bf16.msra.mxu0 %v2889_v22  ;;  %2433 = vmatpush1.bf16.msra.mxu1 %v2895_v26 }
 0x6c0   :  { %2403 = vmatprep.subr.bf16.mxu0 %v2900_v30  ;;  %2435 = vmatprep.subr.bf16.mxu1 %v2906_v35 }
 0x6c3   :  { %2405 = vmatpush1.bf16.msra.mxu0 %v2904_v34  ;;  %2437 = vmatpush1.bf16.msra.mxu1 %v2910_v38 }
 0x6c4   :  { %2407 = vmatprep.subr.bf16.mxu0 %v2914_v42  ;;  %2439 = vmatprep.subr.bf16.mxu1 %v2919_v47 }
 0x6c7   :  { %2409 = vmatpush1.bf16.msra.mxu0 %v2917_v46  ;;  %2441 = vmatpush1.bf16.msra.mxu1 %v2922_v50 }
 0x6c8   :  { %2411 = vmatprep.subr.bf16.mxu0 %v2926_v54  ;;  %2443 = vmatprep.subr.bf16.mxu1 %v2931_v62 }
 0x6cb   :  { %2413 = vmatpush1.bf16.msra.mxu0 %v2929_v59  ;;  %2445 = vmatpush1.bf16.msra.mxu1 %v2934_v3 }
 0x6cc   :  { %2415 = vmatprep.subr.bf16.mxu0 %v2938_v11  ;;  %2447 = vmatprep.subr.bf16.mxu1 %v2942_v17  ;;  %v1742_v11 = vld [vmem:[#allocation7] sm:$0xff] }
 0x6cf   :  { %2417 = vmatpush1.bf16.msra.mxu0 %v2940_v12  ;;  %2449 = vmatpush1.bf16.msra.mxu1 %v2946_v24  ;;  %v1743_v12 = vld [vmem:[#allocation7 + $0x8] sm:$0xff]  ;;  %v2724_v24 = vmov 0.0|0.0  }
 0x6d0   :  { %2419 = vmatprep.subr.bf16.mxu0 %v2948_v25  ;;  %2451 = vmatprep.subr.bf16.mxu1 %v2954_v37  ;;  %v2455_v17 = vpack.c.bf16 %v1743_v12, %v1742_v11  ;;  %v1744_v25 = vld [vmem:[#allocation7 + $0x10] sm:$0xff] }
 0x6d3   :  { %2421 = vmatpush1.bf16.msra.mxu0 %v2952_v36  ;;  %2453 = vmatpush1.bf16.msra.mxu1 %v2958_v39  ;;  %v1745_v36 = vld [vmem:[#allocation7 + $0x18] sm:$0xff]  ;;  %v1746_v39 = vld [vmem:[#allocation7 + $0x20] sm:$0xff] }
 0x6d4   :  { %2454 = vmatprep.subr.bf16.mxu0 %v2724_v24  ;;  %v2458_v37 = vpack.c.bf16 %v1745_v36, %v1744_v25  ;;  %v2461_v41 = vpack.c.bf16 %v1747_v40, %v1746_v39 }
 0x789   :  { %v1464_v60 = vpop.f32.mrb[12].mxu0  ;;  %v1535_v0 = vpop.f32.mrb[12].mxu1 }
 0x78a   :  { %v1883_v4 = vmul.f32 -1.442695, %v1464_v60  ;;  %v1466_v9 = vpop.f32.mrb[13].mxu0  ;;  %v1537_v10 = vpop.f32.mrb[13].mxu1  ;;  %v1885_v18 = vmul.f32 -1.442695, %v1535_v0 }
 0x78b   :  { %v1884_v13 = vmul.f32 -1.442695, %v1466_v9 }
 0x78c   :  { %2612 = vpow2.f32 %v1883_v4 }
 0x78d   :  { %2614 = vpow2.f32 %v1884_v13  ;;  %v1889_v13 = vld [vmem:[%s3206_s4] ss:$0 sm:$0xff] }
 0x78e   :  { %2616 = vtanh.f32 %v1537_v10 }
 0x78f   :  { %2618 = vpow2.f32 %v1885_v18 }
 0x796   :  { %v2613_v22 = vpop.eup %2612 }
 0x797   :  { %v1553_v23 = vadd.f32 1.0, %v2613_v22  ;;  %v2615_v26 = vpop.eup %2614 }
 0x798   :  { %v1554_v30 = vadd.f32 1.0, %v2615_v26  ;;  %v2617_v34 = vpop.eup %2616 }
 0x799   :  { %2620 = vrcp.f32 %v1553_v23  ;;  %v2619_v35 = vpop.eup %2618 }
 0x79a   :  { %2622 = vrcp.f32 %v1554_v30  ;;  %v1555_v47 = vadd.f32 1.0, %v2619_v35 }
 0x79c   :  { %2624 = vrcp.f32 %v1555_v47 }
 0x7a3   :  { %v2621_v38 = vpop.eup %2620 }
 0x7a4   :  { %v1564_v42 = vmul.f32 %v2621_v38, %v2617_v34  ;;  %v2623_v46 = vpop.eup %2622 }
 0x7a5   :  { %v1563_v50 = vmul.f32 %v2623_v46, %v3155_v29 }
 0x7a6   :  { %v2625_v59 = vpop.eup %2624 }
 0x7a7   :  { %v3191_v54 = vadd.f32 %v1564_v42, %v1563_v50 }
 0x7a9   :  { %2626 = vtanh.f32 %v3191_v54 }
 0x7b3   :  { %v2627_v62 = vpop.eup %2626 }
 0x7b4   :  { %v1567_v3 = vmul.f32 %v2627_v62, %v2625_v59 }
 0x7b6   :  { %1637 = vmatmul.mubr.f32.vlgmr.msra.gmra.mrb[14].mxu0 %v1567_v3  ;;  %1708 = vmatmul.mubr.f32.vlgmr.msra.gmra.mrb[14].mxu1 %v1567_v3 }
 0x7b7   :  { %2456 = vmatpush3.bf16.msra.mxu0 %v2455_v17  ;;  %1939 = vmatprep.mubr.msk.f32.mxu0 %vm2725_vm8, %v2722_v7 }
 0x7b8   :  { %2457 = vmatprep.subr.bf16.mxu0 %v2724_v24 }
 0x7bb   :  { %2459 = vmatpush3.bf16.msra.mxu0 %v2458_v37 }
 0x7bc   :  { %2460 = vmatprep.subr.bf16.mxu0 %v2724_v24 }
 0x7bf   :  { %2462 = vmatpush3.bf16.msra.mxu0 %v2461_v41 }
 0x7c0   :  { %2463 = vmatprep.subr.bf16.mxu0 %v2724_v24 }
 0x7c3   :  { %2465 = vmatpush3.bf16.msra.mxu0 %v2464_v45 }
 0x7c4   :  { %2466 = vmatprep.subr.bf16.mxu0 %v2724_v24 }
 0x7c7   :  { %2468 = vmatpush3.bf16.msra.mxu0 %v2467_v51 }
 0x7c8   :  { %2469 = vmatprep.subr.bf16.mxu0 %v2724_v24 }
 0x7cb   :  { %2471 = vmatpush3.bf16.msra.mxu0 %v2470_v55 }
 0x7cc   :  { %2472 = vmatprep.subr.bf16.mxu0 %v2724_v24 }
 0x7cf   :  { %2474 = vmatpush3.bf16.msra.mxu0 %v2473_v63 }
 0x7d0   :  { %2475 = vmatprep.subr.bf16.mxu0 %v2724_v24 }
 0x7d3   :  { %2477 = vmatpush3.bf16.msra.mxu0 %v2476_v5 }
 0x889   :  { %v1638_v6 = vpop.f32.mrb[14].mxu0  ;;  %v1709_v8 = vpop.f32.mrb[14].mxu1 }
 0x88a   :  { %v1886_v14 = vmul.f32 -1.442695, %v1638_v6  ;;  %v1640_v15 = vpop.f32.mrb[15].mxu0  ;;  %v1711_v16 = vpop.f32.mrb[15].mxu1  ;;  %v1888_v19 = vmul.f32 -1.442695, %v1709_v8 }
 0x88b   :  { %v1887_v56 = vmul.f32 -1.442695, %v1640_v15 }
 0x88c   :  { %2628 = vpow2.f32 %v1886_v14 }
 0x88d   :  { %2630 = vpow2.f32 %v1887_v56 }
 0x88e   :  { %2632 = vtanh.f32 %v1711_v16 }
 0x88f   :  { %2634 = vpow2.f32 %v1888_v19 }
 0x896   :  { %v2629_v61 = vpop.eup %2628 }
 0x897   :  { %v1727_v7 = vadd.f32 1.0, %v2629_v61  ;;  %v2631_v20 = vpop.eup %2630 }
 0x898   :  { %v1728_v21 = vadd.f32 1.0, %v2631_v20  ;;  %v2633_v27 = vpop.eup %2632 }
 0x899   :  { %2636 = vrcp.f32 %v1727_v7  ;;  %v2635_v28 = vpop.eup %2634 }
 0x89a   :  { %2638 = vrcp.f32 %v1728_v21  ;;  %v1729_v33 = vadd.f32 1.0, %v2635_v28 }
 0x89c   :  { %2640 = vrcp.f32 %v1729_v33 }
 0x8a3   :  { %v2637_v29 = vpop.eup %2636 }
 0x8a4   :  { %v1738_v31 = vmul.f32 %v2637_v29, %v2633_v27  ;;  %v2639_v32 = vpop.eup %2638 }
 0x8a5   :  { %v1737_v60 = vmul.f32 %v2639_v32, %v3191_v54 }
 0x8a6   :  { %v2641_v4 = vpop.eup %2640 }
 0x8a7   :  { %v1739_v0 = vadd.f32 %v1738_v31, %v1737_v60 }
 0x8a9   :  { %2642 = vtanh.f32 %v1739_v0 }
 0x8b3   :  { %v2643_v9 = vpop.eup %2642 }
 0x8b4   :  { %v1741_v10 = vmul.f32 %v2643_v9, %v2641_v4 }
 0x8b6   :  { %1940 = vmatmul.mubr.f32.vlgmr.msra.gmra.mrb[16].mxu0 %v1741_v10 }
 0x989   :  { %v1831_v18 = vpop.f32.mrb[16].mxu0 }
 0x98a   :  { %v1832_v22 = vadd.f32 %v1889_v13, %v1831_v18  ;;  %v1941_v23 = vpop.f32.mrb[17].mxu0 }
 0x98c   :  { %1835 = vst [vmem:[%s3207_s5] sm:$0xff] %v1832_v22 }
 0x98d   :  { %1840 = vsyncpa [#allocation4], 1 }
 0x98e   :  { %1841 = vsyncpa [#allocation6], 1 }

</bundles_post_ra>
